<compile_context>
chip_gen: v6e
topology: v6e:2x2x1
jax: 0.10.0
libtpu: 0.0.40
codegen_flags: <defaults>
</compile_context>

<pallas_src>
import functools

import jax
import jax.numpy as jnp
import numpy as np
from jax.experimental import pallas as pl
from jax.experimental.pallas import tpu as pltpu


# ----------------------------------------------------------------------------
# Shared math (used by both the Pallas kernel body and the pure-JAX reference;
# only the `roll` primitive differs, so the two paths are numerically identical)
# ----------------------------------------------------------------------------
def _conv3x3_taps(x2d, w_taps_bf, masks, *, W, roll):
    """'Same' 3x3 conv in channels-first layout (scales already folded in).

    x2d:       [Cin, H*W] float32, pixels flattened row-major on the lane axis.
    w_taps_bf: [9, Cout, Cin] bfloat16; tap t = (kh*3 + kw) corresponds to the
               PyTorch conv weight w[:, :, kh, kw] (kh, kw in 0..2).
    masks:     [9, H*W] float32 validity masks (1.0 inside the image, 0.0 for
               pixels that a circular roll would wrap across a border).
    Returns [Cout, H*W] float32 (bf16 MXU inputs, f32 accumulation).
    """
    Cout = w_taps_bf.shape[1]
    HW = x2d.shape[1]
    acc = jnp.zeros((Cout, HW), jnp.float32)
    t = 0
    for di in (-1, 0, 1):
        for dj in (-1, 0, 1):
            # value needed at output pixel p is input pixel p + di*W + dj
            shift = (-(di * W + dj)) % HW
            xs = roll(x2d, shift) if shift else x2d
            if not (di == 0 and dj == 0):      # center tap is always valid
                xs = xs * masks[t:t + 1, :]
            acc = acc + jnp.dot(w_taps_bf[t], xs.astype(jnp.bfloat16),
                                preferred_element_type=jnp.float32)
            t += 1
    return acc


def _flow_step_math(x2d, masks, an_b, winv, w1, b1, w2, b2, w3, b3, *, W, roll):
    """FlowStep.normal_flow on a single sample; x2d is [C, H*W] float32.

    All exp(logs) scales are pre-folded into winv / w1 / w2 / w3 and the biases.
    """
    C = x2d.shape[0]
    Cf = C // 2
    # ActNorm2d + InvertibleConv1x1:  (W diag(exp(logs))) @ (x + bias)
    z = jnp.dot(winv, (x2d + an_b).astype(jnp.bfloat16),
                preferred_element_type=jnp.float32)
    z1, z2 = z[:Cf], z[Cf:]
    # f(z1): Conv2d 3x3 (no bias) + ActNorm + ReLU   (scale folded into w1/b1)
    h = jnp.maximum(_conv3x3_taps(z1, w1, masks, W=W, roll=roll) + b1, 0.0)
    #        Conv2d 1x1 (no bias) + ActNorm + ReLU   (scale folded into w2/b2)
    h = jnp.dot(w2, h.astype(jnp.bfloat16), preferred_element_type=jnp.float32)
    h = jnp.maximum(h + b2, 0.0)
    #        Conv2dZeros 3x3 (+bias, * exp(logs*3))  (scale folded into w3/b3)
    fz1 = _conv3x3_taps(h, w3, masks, W=W, roll=roll) + b3
    # additive coupling + cat_feature, fused into the output slab
    return jnp.concatenate([z1, z2 + fz1], axis=0)


# ----------------------------------------------------------------------------
# Pallas kernel
# ----------------------------------------------------------------------------
def _flow_step_kernel(W, x_ref, masks_ref, an_b_ref, winv_ref,
                      w1_ref, b1_ref, w2_ref, b2_ref, w3_ref, b3_ref, o_ref):
    roll = lambda a, s: pltpu.roll(a, shift=s, axis=1)
    o_ref[0] = _flow_step_math(
        x_ref[0], masks_ref[...], an_b_ref[...], winv_ref[...],
        w1_ref[...], b1_ref[...], w2_ref[...], b2_ref[...],
        w3_ref[...], b3_ref[...], W=W, roll=roll)


# ----------------------------------------------------------------------------
# Wrapper
# ----------------------------------------------------------------------------
_PARAM_ORDER = ('an_b', 'winv', 'w1', 'b1', 'w2', 'b2', 'w3', 'b3')


def _prepare_params(p, C, Cf, Ch):
    """Fold every exp(logs) scale into the adjacent matmul weight / bias and
    pre-cast the MXU operands to bf16 (trace-time constant folding)."""
    an_s = jnp.exp(p['an_logs'])                       # [C]
    s1 = jnp.exp(p['logs1'])                           # [Ch]
    s2 = jnp.exp(p['logs2'])                           # [Ch]
    s3 = jnp.exp(p['logs3'] * 3.0)                     # [Cf], Conv2dZeros factor 3
    return dict(
        an_b=p['an_bias'].reshape(C, 1),
        winv=(p['w_inv'] * an_s.reshape(1, C)).astype(jnp.bfloat16),
        w1=(p['w1'] * s1.reshape(1, Ch, 1)).astype(jnp.bfloat16),
        b1=(p['b1'] * s1).reshape(Ch, 1),
        w2=(p['w2'] * s2.reshape(Ch, 1)).astype(jnp.bfloat16),
        b2=(p['b2'] * s2).reshape(Ch, 1),
        w3=(p['w3'] * s3.reshape(1, Cf, 1)).astype(jnp.bfloat16),
        b3=(p['b3'] * s3).reshape(Cf, 1),
    )


def _make_masks(H, W):
    """[9, H*W] validity masks for the 9 taps of a 'same' 3x3 conv."""
    HW = H * W
    hh = np.arange(HW) // W
    ww = np.arange(HW) % W
    rows = []
    for di in (-1, 0, 1):
        for dj in (-1, 0, 1):
            valid = ((hh + di >= 0) & (hh + di < H) &
                     (ww + dj >= 0) & (ww + dj < W))
            rows.append(valid.astype(np.float32))
    return jnp.asarray(np.stack(rows, axis=0))


def flow_step_forward(x_nchw, logdet, p, use_pallas=True):
    """FlowStep.forward(reverse=False): additive coupling, invconv permutation."""
    N, C, H, W = x_nchw.shape
    assert C % 2 == 0
    HW = H * W
    Cf, Ch = C // 2, p['w2'].shape[0]
    x = x_nchw.reshape(N, C, HW)
    masks = _make_masks(H, W)
    prep = _prepare_params(p, C, Cf, Ch)
    params = tuple(prep[k] for k in _PARAM_ORDER)

    # scalar log-det glue: actnorm H*W*sum(logs), invconv H*W*log|det W|
    logdet = logdet + HW * (jnp.sum(p['an_logs']) + jnp.linalg.slogdet(p['w_inv'])[1])

    if use_pallas:
        in_specs = [pl.BlockSpec((1, C, HW), lambda n: (n, 0, 0)),
                    pl.BlockSpec(masks.shape, lambda n: (0, 0))]
        for a in params:  # params: full block, constant index -> VMEM-resident
            in_specs.append(pl.BlockSpec(
                a.shape, (lambda n: (0, 0)) if a.ndim == 2 else (lambda n: (0, 0, 0))))

        flops = 2 * N * HW * (C * C + 9 * Cf * Ch + Ch * Ch + 9 * Ch * Cf)
        param_bytes = sum(int(a.size) * a.dtype.itemsize for a in (masks,) + params)
        cost = pl.CostEstimate(flops=flops, transcendentals=0,
                               bytes_accessed=8 * N * C * HW + param_bytes)
        # VMEM budget: double-buffered x/out blocks + params + in-kernel h/taps.
        per_step = 4 * (4 * C * HW + 6 * Ch * HW) + param_bytes
        vmem_limit = int(min(48 << 20, max(32 << 20, 2 * per_step)))

        z = pl.pallas_call(
            functools.partial(_flow_step_kernel, W),
            out_shape=jax.ShapeDtypeStruct((N, C, HW), jnp.float32),
            grid=(N,),
            in_specs=in_specs,
            out_specs=pl.BlockSpec((1, C, HW), lambda n: (n, 0, 0)),
            compiler_params=pltpu.CompilerParams(
                dimension_semantics=("parallel",),   # megacore: shard batch over TCs
                vmem_limit_bytes=vmem_limit),
            cost_estimate=cost,
        )(x, masks, *params)
    else:
        roll = lambda a, s: jnp.roll(a, s, axis=1)
        z = jax.vmap(
            lambda xb: _flow_step_math(xb, masks, *params, W=W, roll=roll))(x)

    # TODO(synk): add spatial (H) halo tiling for very large H*W; currently each
    # grid step keeps one full sample's activations resident in VMEM.
    return z.reshape(N, C, H, W), logdet


# ----------------------------------------------------------------------------
# Synthetic parameters (channels-first weight layout)
# ----------------------------------------------------------------------------
def init_params(key, in_channels, hidden_channels):
    """Synthetic FlowStep parameters.  The real Conv2dZeros is zero-initialized;
    small random values are used so the whole kernel path is exercised.

    Conv weights are channels-first:
      w1 [9, Ch, Cf]  tap t=(kh*3+kw) of the 3x3 Conv2d(Cf->Ch) (= torch w[:,:,kh,kw])
      w2 [Ch, Ch]     1x1 Conv2d(Ch->Ch)
      w3 [9, Cf, Ch]  tap t of the 3x3 Conv2dZeros(Ch->Cf)
    """
    C, Ch, Cf = in_channels, hidden_channels, in_channels // 2
    ks = jax.random.split(key, 10)
    s = 0.05
    an_bias = s * jax.random.normal(ks[0], (C,), jnp.float32)
    an_logs = s * jax.random.normal(ks[1], (C,), jnp.float32)
    w_inv = jnp.linalg.qr(jax.random.normal(ks[2], (C, C), jnp.float32))[0]
    w1 = s * jax.random.normal(ks[3], (9, Ch, Cf), jnp.float32)
    b1 = s * jax.random.normal(ks[4], (Ch,), jnp.float32)
    logs1 = s * jax.random.normal(ks[5], (Ch,), jnp.float32)
    w2 = s * jax.random.normal(ks[6], (Ch, Ch), jnp.float32)
    b2 = s * jax.random.normal(ks[7], (Ch,), jnp.float32)
    logs2 = jnp.zeros((Ch,), jnp.float32)
    w3 = s * jax.random.normal(ks[8], (9, Cf, Ch), jnp.float32)
    b3 = s * jax.random.normal(ks[9], (Cf,), jnp.float32)
    logs3 = jnp.zeros((Cf,), jnp.float32)
    return dict(an_bias=an_bias, an_logs=an_logs, w_inv=w_inv,
                w1=w1, b1=b1, logs1=logs1, w2=w2, b2=b2, logs2=logs2,
                w3=w3, b3=b3, logs3=logs3)


if __name__ == "__main__":
    key = jax.random.PRNGKey(0)
    kx, kp = jax.random.split(key)

    N, C, H, W = 2, 4, 16, 16
    hidden = 32
    x = jax.random.normal(kx, (N, C, H, W), jnp.float32)
    logdet0 = jnp.zeros((N,), jnp.float32)
    params = init_params(kp, C, hidden)

    z, logdet = flow_step_forward(x, logdet0, params, use_pallas=True)
    z = jax.block_until_ready(z)
    logdet = jax.block_until_ready(logdet)

    # correctness: pure-JAX reference of the exact same math (same folded bf16
    # MXU weights / f32 accumulation / tap order), so tolerances can be tight.
    z_ref, logdet_ref = flow_step_forward(x, logdet0, params, use_pallas=False)
    np.testing.assert_allclose(np.asarray(z), np.asarray(z_ref), rtol=1e-5, atol=1e-5)
    np.testing.assert_allclose(np.asarray(logdet), np.asarray(logdet_ref),
                               rtol=1e-5, atol=1e-5)
    assert z.shape == (N, C, H, W) and logdet.shape == (N,)

    print("KERNEL_OK")
</pallas_src>

<mosaic_0001>
module attributes {stable_mosaic.version = 11 : i64} {
  func.func @_flow_step_kernel(%arg0: i32, %arg1: memref<1x4x256xf32, #tpu.memory_space<vmem>>, %arg2: memref<9x256xf32, #tpu.memory_space<vmem>>, %arg3: memref<4x1xf32, #tpu.memory_space<vmem>>, %arg4: memref<4x4xbf16, #tpu.memory_space<vmem>>, %arg5: memref<9x32x2xbf16, #tpu.memory_space<vmem>>, %arg6: memref<32x1xf32, #tpu.memory_space<vmem>>, %arg7: memref<32x32xbf16, #tpu.memory_space<vmem>>, %arg8: memref<32x1xf32, #tpu.memory_space<vmem>>, %arg9: memref<9x2x32xbf16, #tpu.memory_space<vmem>>, %arg10: memref<2x1xf32, #tpu.memory_space<vmem>>, %arg11: memref<1x4x256xf32, #tpu.memory_space<vmem>>) attributes {dimension_semantics = [#tpu.dimension_semantics<parallel>], iteration_bounds = array<i64: 2>, scalar_prefetch = 0 : i64, scratch_operands = 0 : i64, tpu.core_type = #tpu.core_type<tc>, window_params = [{transform_indices = @transform_0, window_bounds = array<i64: 1, 4, 256>}, {pipeline_mode = #tpu.pipeline_mode<synchronous>, transform_indices = @transform_1, window_bounds = array<i64: 9, 256>}, {pipeline_mode = #tpu.pipeline_mode<synchronous>, transform_indices = @transform_2, window_bounds = array<i64: 4, 1>}, {pipeline_mode = #tpu.pipeline_mode<synchronous>, transform_indices = @transform_3, window_bounds = array<i64: 4, 4>}, {pipeline_mode = #tpu.pipeline_mode<synchronous>, transform_indices = @transform_4, window_bounds = array<i64: 9, 32, 2>}, {pipeline_mode = #tpu.pipeline_mode<synchronous>, transform_indices = @transform_5, window_bounds = array<i64: 32, 1>}, {pipeline_mode = #tpu.pipeline_mode<synchronous>, transform_indices = @transform_6, window_bounds = array<i64: 32, 32>}, {pipeline_mode = #tpu.pipeline_mode<synchronous>, transform_indices = @transform_7, window_bounds = array<i64: 32, 1>}, {pipeline_mode = #tpu.pipeline_mode<synchronous>, transform_indices = @transform_8, window_bounds = array<i64: 9, 2, 32>}, {pipeline_mode = #tpu.pipeline_mode<synchronous>, transform_indices = @transform_9, window_bounds = array<i64: 2, 1>}, {transform_indices = @transform_10, window_bounds = array<i64: 1, 4, 256>}]} {
    %c0 = arith.constant 0 : index
    %c0_0 = arith.constant 0 : index
    %c0_1 = arith.constant 0 : index
    %0 = vector.load %arg1[%c0, %c0_0, %c0_1] : memref<1x4x256xf32, #tpu.memory_space<vmem>>, vector<1x4x256xf32>
    %1 = vector.shape_cast %0 : vector<1x4x256xf32> to vector<4x256xf32>
    %c0_2 = arith.constant 0 : index
    %c0_3 = arith.constant 0 : index
    %2 = vector.load %arg2[%c0_2, %c0_3] : memref<9x256xf32, #tpu.memory_space<vmem>>, vector<9x256xf32>
    %c0_4 = arith.constant 0 : index
    %c0_5 = arith.constant 0 : index
    %3 = vector.load %arg3[%c0_4, %c0_5] : memref<4x1xf32, #tpu.memory_space<vmem>>, vector<4x1xf32>
    %c0_6 = arith.constant 0 : index
    %c0_7 = arith.constant 0 : index
    %4 = vector.load %arg4[%c0_6, %c0_7] : memref<4x4xbf16, #tpu.memory_space<vmem>>, vector<4x4xbf16>
    %c0_8 = arith.constant 0 : index
    %c0_9 = arith.constant 0 : index
    %c0_10 = arith.constant 0 : index
    %5 = vector.load %arg5[%c0_8, %c0_9, %c0_10] : memref<9x32x2xbf16, #tpu.memory_space<vmem>>, vector<9x32x2xbf16>
    %c0_11 = arith.constant 0 : index
    %c0_12 = arith.constant 0 : index
    %6 = vector.load %arg6[%c0_11, %c0_12] : memref<32x1xf32, #tpu.memory_space<vmem>>, vector<32x1xf32>
    %c0_13 = arith.constant 0 : index
    %c0_14 = arith.constant 0 : index
    %7 = vector.load %arg7[%c0_13, %c0_14] : memref<32x32xbf16, #tpu.memory_space<vmem>>, vector<32x32xbf16>
    %c0_15 = arith.constant 0 : index
    %c0_16 = arith.constant 0 : index
    %8 = vector.load %arg8[%c0_15, %c0_16] : memref<32x1xf32, #tpu.memory_space<vmem>>, vector<32x1xf32>
    %c0_17 = arith.constant 0 : index
    %c0_18 = arith.constant 0 : index
    %c0_19 = arith.constant 0 : index
    %9 = vector.load %arg9[%c0_17, %c0_18, %c0_19] : memref<9x2x32xbf16, #tpu.memory_space<vmem>>, vector<9x2x32xbf16>
    %c0_20 = arith.constant 0 : index
    %c0_21 = arith.constant 0 : index
    %10 = vector.load %arg10[%c0_20, %c0_21] : memref<2x1xf32, #tpu.memory_space<vmem>>, vector<2x1xf32>
    %11 = vector.broadcast %3 : vector<4x1xf32> to vector<4x256xf32>
    %12 = arith.addf %1, %11 : vector<4x256xf32>
    %13 = arith.truncf %12 : vector<4x256xf32> to vector<4x256xbf16>
    %cst = arith.constant dense<0.000000e+00> : vector<4x256xf32>
    %14 = tpu.matmul %4, %13, %cst {dimension_numbers = #tpu.dot_dimension_numbers<[1], [0], [0], [1], [0, 0, 1, 1], [], []>} : vector<4x4xbf16>, vector<4x256xbf16>, vector<4x256xf32> -> vector<4x256xf32>
    %15 = vector.extract_strided_slice %14 {offsets = [0, 0], sizes = [2, 256], strides = [1, 1]} : vector<4x256xf32> to vector<2x256xf32>
    %16 = vector.extract_strided_slice %14 {offsets = [2, 0], sizes = [2, 256], strides = [1, 1]} : vector<4x256xf32> to vector<2x256xf32>
    %cst_22 = arith.constant 0.000000e+00 : f32
    %17 = vector.broadcast %cst_22 : f32 to vector<32x256xf32>
    %c17_i32 = arith.constant 17 : i32
    %18 = tpu.dynamic_rotate %15 by %c17_i32 dim 1 : vector<2x256xf32>, i32 -> vector<2x256xf32>
    %19 = vector.extract_strided_slice %2 {offsets = [0, 0], sizes = [1, 256], strides = [1, 1]} : vector<9x256xf32> to vector<1x256xf32>
    %20 = vector.broadcast %19 : vector<1x256xf32> to vector<2x256xf32>
    %21 = arith.mulf %18, %20 : vector<2x256xf32>
    %22 = vector.extract_strided_slice %5 {offsets = [0, 0, 0], sizes = [1, 32, 2], strides = [1, 1, 1]} : vector<9x32x2xbf16> to vector<1x32x2xbf16>
    %23 = vector.shape_cast %22 : vector<1x32x2xbf16> to vector<32x2xbf16>
    %24 = arith.truncf %21 : vector<2x256xf32> to vector<2x256xbf16>
    %cst_23 = arith.constant dense<0.000000e+00> : vector<32x256xf32>
    %25 = tpu.matmul %23, %24, %cst_23 {dimension_numbers = #tpu.dot_dimension_numbers<[1], [0], [0], [1], [0, 0, 1, 1], [], []>} : vector<32x2xbf16>, vector<2x256xbf16>, vector<32x256xf32> -> vector<32x256xf32>
    %26 = arith.addf %17, %25 : vector<32x256xf32>
    %c16_i32 = arith.constant 16 : i32
    %27 = tpu.dynamic_rotate %15 by %c16_i32 dim 1 : vector<2x256xf32>, i32 -> vector<2x256xf32>
    %28 = vector.extract_strided_slice %2 {offsets = [1, 0], sizes = [1, 256], strides = [1, 1]} : vector<9x256xf32> to vector<1x256xf32>
    %29 = vector.broadcast %28 : vector<1x256xf32> to vector<2x256xf32>
    %30 = arith.mulf %27, %29 : vector<2x256xf32>
    %31 = vector.extract_strided_slice %5 {offsets = [1, 0, 0], sizes = [1, 32, 2], strides = [1, 1, 1]} : vector<9x32x2xbf16> to vector<1x32x2xbf16>
    %32 = vector.shape_cast %31 : vector<1x32x2xbf16> to vector<32x2xbf16>
    %33 = arith.truncf %30 : vector<2x256xf32> to vector<2x256xbf16>
    %cst_24 = arith.constant dense<0.000000e+00> : vector<32x256xf32>
    %34 = tpu.matmul %32, %33, %cst_24 {dimension_numbers = #tpu.dot_dimension_numbers<[1], [0], [0], [1], [0, 0, 1, 1], [], []>} : vector<32x2xbf16>, vector<2x256xbf16>, vector<32x256xf32> -> vector<32x256xf32>
    %35 = arith.addf %26, %34 : vector<32x256xf32>
    %c15_i32 = arith.constant 15 : i32
    %36 = tpu.dynamic_rotate %15 by %c15_i32 dim 1 : vector<2x256xf32>, i32 -> vector<2x256xf32>
    %37 = vector.extract_strided_slice %2 {offsets = [2, 0], sizes = [1, 256], strides = [1, 1]} : vector<9x256xf32> to vector<1x256xf32>
    %38 = vector.broadcast %37 : vector<1x256xf32> to vector<2x256xf32>
    %39 = arith.mulf %36, %38 : vector<2x256xf32>
    %40 = vector.extract_strided_slice %5 {offsets = [2, 0, 0], sizes = [1, 32, 2], strides = [1, 1, 1]} : vector<9x32x2xbf16> to vector<1x32x2xbf16>
    %41 = vector.shape_cast %40 : vector<1x32x2xbf16> to vector<32x2xbf16>
    %42 = arith.truncf %39 : vector<2x256xf32> to vector<2x256xbf16>
    %cst_25 = arith.constant dense<0.000000e+00> : vector<32x256xf32>
    %43 = tpu.matmul %41, %42, %cst_25 {dimension_numbers = #tpu.dot_dimension_numbers<[1], [0], [0], [1], [0, 0, 1, 1], [], []>} : vector<32x2xbf16>, vector<2x256xbf16>, vector<32x256xf32> -> vector<32x256xf32>
    %44 = arith.addf %35, %43 : vector<32x256xf32>
    %c1_i32 = arith.constant 1 : i32
    %45 = tpu.dynamic_rotate %15 by %c1_i32 dim 1 : vector<2x256xf32>, i32 -> vector<2x256xf32>
    %46 = vector.extract_strided_slice %2 {offsets = [3, 0], sizes = [1, 256], strides = [1, 1]} : vector<9x256xf32> to vector<1x256xf32>
    %47 = vector.broadcast %46 : vector<1x256xf32> to vector<2x256xf32>
    %48 = arith.mulf %45, %47 : vector<2x256xf32>
    %49 = vector.extract_strided_slice %5 {offsets = [3, 0, 0], sizes = [1, 32, 2], strides = [1, 1, 1]} : vector<9x32x2xbf16> to vector<1x32x2xbf16>
    %50 = vector.shape_cast %49 : vector<1x32x2xbf16> to vector<32x2xbf16>
    %51 = arith.truncf %48 : vector<2x256xf32> to vector<2x256xbf16>
    %cst_26 = arith.constant dense<0.000000e+00> : vector<32x256xf32>
    %52 = tpu.matmul %50, %51, %cst_26 {dimension_numbers = #tpu.dot_dimension_numbers<[1], [0], [0], [1], [0, 0, 1, 1], [], []>} : vector<32x2xbf16>, vector<2x256xbf16>, vector<32x256xf32> -> vector<32x256xf32>
    %53 = arith.addf %44, %52 : vector<32x256xf32>
    %54 = vector.extract_strided_slice %5 {offsets = [4, 0, 0], sizes = [1, 32, 2], strides = [1, 1, 1]} : vector<9x32x2xbf16> to vector<1x32x2xbf16>
    %55 = vector.shape_cast %54 : vector<1x32x2xbf16> to vector<32x2xbf16>
    %56 = arith.truncf %15 : vector<2x256xf32> to vector<2x256xbf16>
    %cst_27 = arith.constant dense<0.000000e+00> : vector<32x256xf32>
    %57 = tpu.matmul %55, %56, %cst_27 {dimension_numbers = #tpu.dot_dimension_numbers<[1], [0], [0], [1], [0, 0, 1, 1], [], []>} : vector<32x2xbf16>, vector<2x256xbf16>, vector<32x256xf32> -> vector<32x256xf32>
    %58 = arith.addf %53, %57 : vector<32x256xf32>
    %c255_i32 = arith.constant 255 : i32
    %59 = tpu.dynamic_rotate %15 by %c255_i32 dim 1 : vector<2x256xf32>, i32 -> vector<2x256xf32>
    %60 = vector.extract_strided_slice %2 {offsets = [5, 0], sizes = [1, 256], strides = [1, 1]} : vector<9x256xf32> to vector<1x256xf32>
    %61 = vector.broadcast %60 : vector<1x256xf32> to vector<2x256xf32>
    %62 = arith.mulf %59, %61 : vector<2x256xf32>
    %63 = vector.extract_strided_slice %5 {offsets = [5, 0, 0], sizes = [1, 32, 2], strides = [1, 1, 1]} : vector<9x32x2xbf16> to vector<1x32x2xbf16>
    %64 = vector.shape_cast %63 : vector<1x32x2xbf16> to vector<32x2xbf16>
    %65 = arith.truncf %62 : vector<2x256xf32> to vector<2x256xbf16>
    %cst_28 = arith.constant dense<0.000000e+00> : vector<32x256xf32>
    %66 = tpu.matmul %64, %65, %cst_28 {dimension_numbers = #tpu.dot_dimension_numbers<[1], [0], [0], [1], [0, 0, 1, 1], [], []>} : vector<32x2xbf16>, vector<2x256xbf16>, vector<32x256xf32> -> vector<32x256xf32>
    %67 = arith.addf %58, %66 : vector<32x256xf32>
    %c241_i32 = arith.constant 241 : i32
    %68 = tpu.dynamic_rotate %15 by %c241_i32 dim 1 : vector<2x256xf32>, i32 -> vector<2x256xf32>
    %69 = vector.extract_strided_slice %2 {offsets = [6, 0], sizes = [1, 256], strides = [1, 1]} : vector<9x256xf32> to vector<1x256xf32>
    %70 = vector.broadcast %69 : vector<1x256xf32> to vector<2x256xf32>
    %71 = arith.mulf %68, %70 : vector<2x256xf32>
    %72 = vector.extract_strided_slice %5 {offsets = [6, 0, 0], sizes = [1, 32, 2], strides = [1, 1, 1]} : vector<9x32x2xbf16> to vector<1x32x2xbf16>
    %73 = vector.shape_cast %72 : vector<1x32x2xbf16> to vector<32x2xbf16>
    %74 = arith.truncf %71 : vector<2x256xf32> to vector<2x256xbf16>
    %cst_29 = arith.constant dense<0.000000e+00> : vector<32x256xf32>
    %75 = tpu.matmul %73, %74, %cst_29 {dimension_numbers = #tpu.dot_dimension_numbers<[1], [0], [0], [1], [0, 0, 1, 1], [], []>} : vector<32x2xbf16>, vector<2x256xbf16>, vector<32x256xf32> -> vector<32x256xf32>
    %76 = arith.addf %67, %75 : vector<32x256xf32>
    %c240_i32 = arith.constant 240 : i32
    %77 = tpu.dynamic_rotate %15 by %c240_i32 dim 1 : vector<2x256xf32>, i32 -> vector<2x256xf32>
    %78 = vector.extract_strided_slice %2 {offsets = [7, 0], sizes = [1, 256], strides = [1, 1]} : vector<9x256xf32> to vector<1x256xf32>
    %79 = vector.broadcast %78 : vector<1x256xf32> to vector<2x256xf32>
    %80 = arith.mulf %77, %79 : vector<2x256xf32>
    %81 = vector.extract_strided_slice %5 {offsets = [7, 0, 0], sizes = [1, 32, 2], strides = [1, 1, 1]} : vector<9x32x2xbf16> to vector<1x32x2xbf16>
    %82 = vector.shape_cast %81 : vector<1x32x2xbf16> to vector<32x2xbf16>
    %83 = arith.truncf %80 : vector<2x256xf32> to vector<2x256xbf16>
    %cst_30 = arith.constant dense<0.000000e+00> : vector<32x256xf32>
    %84 = tpu.matmul %82, %83, %cst_30 {dimension_numbers = #tpu.dot_dimension_numbers<[1], [0], [0], [1], [0, 0, 1, 1], [], []>} : vector<32x2xbf16>, vector<2x256xbf16>, vector<32x256xf32> -> vector<32x256xf32>
    %85 = arith.addf %76, %84 : vector<32x256xf32>
    %c239_i32 = arith.constant 239 : i32
    %86 = tpu.dynamic_rotate %15 by %c239_i32 dim 1 : vector<2x256xf32>, i32 -> vector<2x256xf32>
    %87 = vector.extract_strided_slice %2 {offsets = [8, 0], sizes = [1, 256], strides = [1, 1]} : vector<9x256xf32> to vector<1x256xf32>
    %88 = vector.broadcast %87 : vector<1x256xf32> to vector<2x256xf32>
    %89 = arith.mulf %86, %88 : vector<2x256xf32>
    %90 = vector.extract_strided_slice %5 {offsets = [8, 0, 0], sizes = [1, 32, 2], strides = [1, 1, 1]} : vector<9x32x2xbf16> to vector<1x32x2xbf16>
    %91 = vector.shape_cast %90 : vector<1x32x2xbf16> to vector<32x2xbf16>
    %92 = arith.truncf %89 : vector<2x256xf32> to vector<2x256xbf16>
    %cst_31 = arith.constant dense<0.000000e+00> : vector<32x256xf32>
    %93 = tpu.matmul %91, %92, %cst_31 {dimension_numbers = #tpu.dot_dimension_numbers<[1], [0], [0], [1], [0, 0, 1, 1], [], []>} : vector<32x2xbf16>, vector<2x256xbf16>, vector<32x256xf32> -> vector<32x256xf32>
    %94 = arith.addf %85, %93 : vector<32x256xf32>
    %95 = vector.broadcast %6 : vector<32x1xf32> to vector<32x256xf32>
    %96 = arith.addf %94, %95 : vector<32x256xf32>
    %cst_32 = arith.constant 0.000000e+00 : f32
    %97 = vector.broadcast %cst_32 : f32 to vector<32x256xf32>
    %98 = arith.maximumf %96, %97 : vector<32x256xf32>
    %99 = arith.truncf %98 : vector<32x256xf32> to vector<32x256xbf16>
    %cst_33 = arith.constant dense<0.000000e+00> : vector<32x256xf32>
    %100 = tpu.matmul %7, %99, %cst_33 {dimension_numbers = #tpu.dot_dimension_numbers<[1], [0], [0], [1], [0, 0, 1, 1], [], []>} : vector<32x32xbf16>, vector<32x256xbf16>, vector<32x256xf32> -> vector<32x256xf32>
    %101 = vector.broadcast %8 : vector<32x1xf32> to vector<32x256xf32>
    %102 = arith.addf %100, %101 : vector<32x256xf32>
    %cst_34 = arith.constant 0.000000e+00 : f32
    %103 = vector.broadcast %cst_34 : f32 to vector<32x256xf32>
    %104 = arith.maximumf %102, %103 : vector<32x256xf32>
    %cst_35 = arith.constant 0.000000e+00 : f32
    %105 = vector.broadcast %cst_35 : f32 to vector<2x256xf32>
    %c17_i32_36 = arith.constant 17 : i32
    %106 = tpu.dynamic_rotate %104 by %c17_i32_36 dim 1 : vector<32x256xf32>, i32 -> vector<32x256xf32>
    %107 = vector.extract_strided_slice %2 {offsets = [0, 0], sizes = [1, 256], strides = [1, 1]} : vector<9x256xf32> to vector<1x256xf32>
    %108 = vector.broadcast %107 : vector<1x256xf32> to vector<32x256xf32>
    %109 = arith.mulf %106, %108 : vector<32x256xf32>
    %110 = vector.extract_strided_slice %9 {offsets = [0, 0, 0], sizes = [1, 2, 32], strides = [1, 1, 1]} : vector<9x2x32xbf16> to vector<1x2x32xbf16>
    %111 = vector.shape_cast %110 : vector<1x2x32xbf16> to vector<2x32xbf16>
    %112 = arith.truncf %109 : vector<32x256xf32> to vector<32x256xbf16>
    %cst_37 = arith.constant dense<0.000000e+00> : vector<2x256xf32>
    %113 = tpu.matmul %111, %112, %cst_37 {dimension_numbers = #tpu.dot_dimension_numbers<[1], [0], [0], [1], [0, 0, 1, 1], [], []>} : vector<2x32xbf16>, vector<32x256xbf16>, vector<2x256xf32> -> vector<2x256xf32>
    %114 = arith.addf %105, %113 : vector<2x256xf32>
    %c16_i32_38 = arith.constant 16 : i32
    %115 = tpu.dynamic_rotate %104 by %c16_i32_38 dim 1 : vector<32x256xf32>, i32 -> vector<32x256xf32>
    %116 = vector.extract_strided_slice %2 {offsets = [1, 0], sizes = [1, 256], strides = [1, 1]} : vector<9x256xf32> to vector<1x256xf32>
    %117 = vector.broadcast %116 : vector<1x256xf32> to vector<32x256xf32>
    %118 = arith.mulf %115, %117 : vector<32x256xf32>
    %119 = vector.extract_strided_slice %9 {offsets = [1, 0, 0], sizes = [1, 2, 32], strides = [1, 1, 1]} : vector<9x2x32xbf16> to vector<1x2x32xbf16>
    %120 = vector.shape_cast %119 : vector<1x2x32xbf16> to vector<2x32xbf16>
    %121 = arith.truncf %118 : vector<32x256xf32> to vector<32x256xbf16>
    %cst_39 = arith.constant dense<0.000000e+00> : vector<2x256xf32>
    %122 = tpu.matmul %120, %121, %cst_39 {dimension_numbers = #tpu.dot_dimension_numbers<[1], [0], [0], [1], [0, 0, 1, 1], [], []>} : vector<2x32xbf16>, vector<32x256xbf16>, vector<2x256xf32> -> vector<2x256xf32>
    %123 = arith.addf %114, %122 : vector<2x256xf32>
    %c15_i32_40 = arith.constant 15 : i32
    %124 = tpu.dynamic_rotate %104 by %c15_i32_40 dim 1 : vector<32x256xf32>, i32 -> vector<32x256xf32>
    %125 = vector.extract_strided_slice %2 {offsets = [2, 0], sizes = [1, 256], strides = [1, 1]} : vector<9x256xf32> to vector<1x256xf32>
    %126 = vector.broadcast %125 : vector<1x256xf32> to vector<32x256xf32>
    %127 = arith.mulf %124, %126 : vector<32x256xf32>
    %128 = vector.extract_strided_slice %9 {offsets = [2, 0, 0], sizes = [1, 2, 32], strides = [1, 1, 1]} : vector<9x2x32xbf16> to vector<1x2x32xbf16>
    %129 = vector.shape_cast %128 : vector<1x2x32xbf16> to vector<2x32xbf16>
    %130 = arith.truncf %127 : vector<32x256xf32> to vector<32x256xbf16>
    %cst_41 = arith.constant dense<0.000000e+00> : vector<2x256xf32>
    %131 = tpu.matmul %129, %130, %cst_41 {dimension_numbers = #tpu.dot_dimension_numbers<[1], [0], [0], [1], [0, 0, 1, 1], [], []>} : vector<2x32xbf16>, vector<32x256xbf16>, vector<2x256xf32> -> vector<2x256xf32>
    %132 = arith.addf %123, %131 : vector<2x256xf32>
    %c1_i32_42 = arith.constant 1 : i32
    %133 = tpu.dynamic_rotate %104 by %c1_i32_42 dim 1 : vector<32x256xf32>, i32 -> vector<32x256xf32>
    %134 = vector.extract_strided_slice %2 {offsets = [3, 0], sizes = [1, 256], strides = [1, 1]} : vector<9x256xf32> to vector<1x256xf32>
    %135 = vector.broadcast %134 : vector<1x256xf32> to vector<32x256xf32>
    %136 = arith.mulf %133, %135 : vector<32x256xf32>
    %137 = vector.extract_strided_slice %9 {offsets = [3, 0, 0], sizes = [1, 2, 32], strides = [1, 1, 1]} : vector<9x2x32xbf16> to vector<1x2x32xbf16>
    %138 = vector.shape_cast %137 : vector<1x2x32xbf16> to vector<2x32xbf16>
    %139 = arith.truncf %136 : vector<32x256xf32> to vector<32x256xbf16>
    %cst_43 = arith.constant dense<0.000000e+00> : vector<2x256xf32>
    %140 = tpu.matmul %138, %139, %cst_43 {dimension_numbers = #tpu.dot_dimension_numbers<[1], [0], [0], [1], [0, 0, 1, 1], [], []>} : vector<2x32xbf16>, vector<32x256xbf16>, vector<2x256xf32> -> vector<2x256xf32>
    %141 = arith.addf %132, %140 : vector<2x256xf32>
    %142 = vector.extract_strided_slice %9 {offsets = [4, 0, 0], sizes = [1, 2, 32], strides = [1, 1, 1]} : vector<9x2x32xbf16> to vector<1x2x32xbf16>
    %143 = vector.shape_cast %142 : vector<1x2x32xbf16> to vector<2x32xbf16>
    %144 = arith.truncf %104 : vector<32x256xf32> to vector<32x256xbf16>
    %cst_44 = arith.constant dense<0.000000e+00> : vector<2x256xf32>
    %145 = tpu.matmul %143, %144, %cst_44 {dimension_numbers = #tpu.dot_dimension_numbers<[1], [0], [0], [1], [0, 0, 1, 1], [], []>} : vector<2x32xbf16>, vector<32x256xbf16>, vector<2x256xf32> -> vector<2x256xf32>
    %146 = arith.addf %141, %145 : vector<2x256xf32>
    %c255_i32_45 = arith.constant 255 : i32
    %147 = tpu.dynamic_rotate %104 by %c255_i32_45 dim 1 : vector<32x256xf32>, i32 -> vector<32x256xf32>
    %148 = vector.extract_strided_slice %2 {offsets = [5, 0], sizes = [1, 256], strides = [1, 1]} : vector<9x256xf32> to vector<1x256xf32>
    %149 = vector.broadcast %148 : vector<1x256xf32> to vector<32x256xf32>
    %150 = arith.mulf %147, %149 : vector<32x256xf32>
    %151 = vector.extract_strided_slice %9 {offsets = [5, 0, 0], sizes = [1, 2, 32], strides = [1, 1, 1]} : vector<9x2x32xbf16> to vector<1x2x32xbf16>
    %152 = vector.shape_cast %151 : vector<1x2x32xbf16> to vector<2x32xbf16>
    %153 = arith.truncf %150 : vector<32x256xf32> to vector<32x256xbf16>
    %cst_46 = arith.constant dense<0.000000e+00> : vector<2x256xf32>
    %154 = tpu.matmul %152, %153, %cst_46 {dimension_numbers = #tpu.dot_dimension_numbers<[1], [0], [0], [1], [0, 0, 1, 1], [], []>} : vector<2x32xbf16>, vector<32x256xbf16>, vector<2x256xf32> -> vector<2x256xf32>
    %155 = arith.addf %146, %154 : vector<2x256xf32>
    %c241_i32_47 = arith.constant 241 : i32
    %156 = tpu.dynamic_rotate %104 by %c241_i32_47 dim 1 : vector<32x256xf32>, i32 -> vector<32x256xf32>
    %157 = vector.extract_strided_slice %2 {offsets = [6, 0], sizes = [1, 256], strides = [1, 1]} : vector<9x256xf32> to vector<1x256xf32>
    %158 = vector.broadcast %157 : vector<1x256xf32> to vector<32x256xf32>
    %159 = arith.mulf %156, %158 : vector<32x256xf32>
    %160 = vector.extract_strided_slice %9 {offsets = [6, 0, 0], sizes = [1, 2, 32], strides = [1, 1, 1]} : vector<9x2x32xbf16> to vector<1x2x32xbf16>
    %161 = vector.shape_cast %160 : vector<1x2x32xbf16> to vector<2x32xbf16>
    %162 = arith.truncf %159 : vector<32x256xf32> to vector<32x256xbf16>
    %cst_48 = arith.constant dense<0.000000e+00> : vector<2x256xf32>
    %163 = tpu.matmul %161, %162, %cst_48 {dimension_numbers = #tpu.dot_dimension_numbers<[1], [0], [0], [1], [0, 0, 1, 1], [], []>} : vector<2x32xbf16>, vector<32x256xbf16>, vector<2x256xf32> -> vector<2x256xf32>
    %164 = arith.addf %155, %163 : vector<2x256xf32>
    %c240_i32_49 = arith.constant 240 : i32
    %165 = tpu.dynamic_rotate %104 by %c240_i32_49 dim 1 : vector<32x256xf32>, i32 -> vector<32x256xf32>
    %166 = vector.extract_strided_slice %2 {offsets = [7, 0], sizes = [1, 256], strides = [1, 1]} : vector<9x256xf32> to vector<1x256xf32>
    %167 = vector.broadcast %166 : vector<1x256xf32> to vector<32x256xf32>
    %168 = arith.mulf %165, %167 : vector<32x256xf32>
    %169 = vector.extract_strided_slice %9 {offsets = [7, 0, 0], sizes = [1, 2, 32], strides = [1, 1, 1]} : vector<9x2x32xbf16> to vector<1x2x32xbf16>
    %170 = vector.shape_cast %169 : vector<1x2x32xbf16> to vector<2x32xbf16>
    %171 = arith.truncf %168 : vector<32x256xf32> to vector<32x256xbf16>
    %cst_50 = arith.constant dense<0.000000e+00> : vector<2x256xf32>
    %172 = tpu.matmul %170, %171, %cst_50 {dimension_numbers = #tpu.dot_dimension_numbers<[1], [0], [0], [1], [0, 0, 1, 1], [], []>} : vector<2x32xbf16>, vector<32x256xbf16>, vector<2x256xf32> -> vector<2x256xf32>
    %173 = arith.addf %164, %172 : vector<2x256xf32>
    %c239_i32_51 = arith.constant 239 : i32
    %174 = tpu.dynamic_rotate %104 by %c239_i32_51 dim 1 : vector<32x256xf32>, i32 -> vector<32x256xf32>
    %175 = vector.extract_strided_slice %2 {offsets = [8, 0], sizes = [1, 256], strides = [1, 1]} : vector<9x256xf32> to vector<1x256xf32>
    %176 = vector.broadcast %175 : vector<1x256xf32> to vector<32x256xf32>
    %177 = arith.mulf %174, %176 : vector<32x256xf32>
    %178 = vector.extract_strided_slice %9 {offsets = [8, 0, 0], sizes = [1, 2, 32], strides = [1, 1, 1]} : vector<9x2x32xbf16> to vector<1x2x32xbf16>
    %179 = vector.shape_cast %178 : vector<1x2x32xbf16> to vector<2x32xbf16>
    %180 = arith.truncf %177 : vector<32x256xf32> to vector<32x256xbf16>
    %cst_52 = arith.constant dense<0.000000e+00> : vector<2x256xf32>
    %181 = tpu.matmul %179, %180, %cst_52 {dimension_numbers = #tpu.dot_dimension_numbers<[1], [0], [0], [1], [0, 0, 1, 1], [], []>} : vector<2x32xbf16>, vector<32x256xbf16>, vector<2x256xf32> -> vector<2x256xf32>
    %182 = arith.addf %173, %181 : vector<2x256xf32>
    %183 = vector.broadcast %10 : vector<2x1xf32> to vector<2x256xf32>
    %184 = arith.addf %182, %183 : vector<2x256xf32>
    %185 = arith.addf %16, %184 : vector<2x256xf32>
    %186 = tpu.concatenate %15, %185 in 0 : vector<2x256xf32>, vector<2x256xf32> -> vector<4x256xf32>
    %c0_53 = arith.constant 0 : index
    %c0_54 = arith.constant 0 : index
    %c0_55 = arith.constant 0 : index
    %187 = vector.load %arg11[%c0_53, %c0_54, %c0_55] : memref<1x4x256xf32, #tpu.memory_space<vmem>>, vector<1x4x256xf32>
    %188 = vector.shape_cast %187 : vector<1x4x256xf32> to vector<4x256xf32>
    %189 = vector.shape_cast %186 : vector<4x256xf32> to vector<1x4x256xf32>
    tpu.vector_store %arg11[%c0_53, %c0_54, %c0_55], %189 {strides = array<i32>} : memref<1x4x256xf32, #tpu.memory_space<vmem>>, vector<1x4x256xf32>,
    return
  }
  func.func @transform_0(%arg0: i32) -> (i32, i32, i32) {
    %c0_i32 = arith.constant 0 : i32
    %c0_i32_0 = arith.constant 0 : i32
    %c0_i32_1 = arith.constant 0 : i32
    return %arg0, %c0_i32, %c0_i32_0 : i32, i32, i32
  }
  func.func @transform_1(%arg0: i32) -> (i32, i32) {
    %c0_i32 = arith.constant 0 : i32
    %c0_i32_0 = arith.constant 0 : i32
    %c0_i32_1 = arith.constant 0 : i32
    return %c0_i32, %c0_i32_0 : i32, i32
  }
  func.func @transform_2(%arg0: i32) -> (i32, i32) {
    %c0_i32 = arith.constant 0 : i32
    %c0_i32_0 = arith.constant 0 : i32
    %c0_i32_1 = arith.constant 0 : i32
    return %c0_i32, %c0_i32_0 : i32, i32
  }
  func.func @transform_3(%arg0: i32) -> (i32, i32) {
    %c0_i32 = arith.constant 0 : i32
    %c0_i32_0 = arith.constant 0 : i32
    %c0_i32_1 = arith.constant 0 : i32
    return %c0_i32, %c0_i32_0 : i32, i32
  }
  func.func @transform_4(%arg0: i32) -> (i32, i32, i32) {
    %c0_i32 = arith.constant 0 : i32
    %c0_i32_0 = arith.constant 0 : i32
    %c0_i32_1 = arith.constant 0 : i32
    %c0_i32_2 = arith.constant 0 : i32
    return %c0_i32, %c0_i32_0, %c0_i32_1 : i32, i32, i32
  }
  func.func @transform_5(%arg0: i32) -> (i32, i32) {
    %c0_i32 = arith.constant 0 : i32
    %c0_i32_0 = arith.constant 0 : i32
    %c0_i32_1 = arith.constant 0 : i32
    return %c0_i32, %c0_i32_0 : i32, i32
  }
  func.func @transform_6(%arg0: i32) -> (i32, i32) {
    %c0_i32 = arith.constant 0 : i32
    %c0_i32_0 = arith.constant 0 : i32
    %c0_i32_1 = arith.constant 0 : i32
    return %c0_i32, %c0_i32_0 : i32, i32
  }
  func.func @transform_7(%arg0: i32) -> (i32, i32) {
    %c0_i32 = arith.constant 0 : i32
    %c0_i32_0 = arith.constant 0 : i32
    %c0_i32_1 = arith.constant 0 : i32
    return %c0_i32, %c0_i32_0 : i32, i32
  }
  func.func @transform_8(%arg0: i32) -> (i32, i32, i32) {
    %c0_i32 = arith.constant 0 : i32
    %c0_i32_0 = arith.constant 0 : i32
    %c0_i32_1 = arith.constant 0 : i32
    %c0_i32_2 = arith.constant 0 : i32
    return %c0_i32, %c0_i32_0, %c0_i32_1 : i32, i32, i32
  }
  func.func @transform_9(%arg0: i32) -> (i32, i32) {
    %c0_i32 = arith.constant 0 : i32
    %c0_i32_0 = arith.constant 0 : i32
    %c0_i32_1 = arith.constant 0 : i32
    return %c0_i32, %c0_i32_0 : i32, i32
  }
  func.func @transform_10(%arg0: i32) -> (i32, i32, i32) {
    %c0_i32 = arith.constant 0 : i32
    %c0_i32_0 = arith.constant 0 : i32
    %c0_i32_1 = arith.constant 0 : i32
    return %arg0, %c0_i32, %c0_i32_0 : i32, i32, i32
  }
}

</mosaic_0001>

<bundles_post_ra>
// kernel: tpu_custom_call.1
= control target key start
LH: loop header
LB: loop body
LE: loop exit
PB: predicated region body
PF: predicated region fallthrough
CT: control target
= control target key end

     0   :  { %s3673_s0 = inlined_call_operand.vmem [shape: f32[2,4,256], index: 0, kind: input, shape index: {}]   ;;  %s3674_s1 = inlined_call_operand.vmem [shape: f32[9,256], index: 1, kind: input, shape index: {}]   ;;  %s3675_s2 = inlined_call_operand.vmem [shape: f32[4,1], index: 2, kind: input, shape index: {}]   ;;  %s3676_s3 = inlined_call_operand.vmem [shape: bf16[4,4], index: 3, kind: input, shape index: {}]   ;;  %s3677_s4 = inlined_call_operand.vmem [shape: bf16[9,32,2], index: 4, kind: input, shape index: {}]   ;;  %s3678_s5 = inlined_call_operand.vmem [shape: f32[32,1], index: 5, kind: input, shape index: {}]   ;;  %s3679_s6 = inlined_call_operand.vmem [shape: bf16[32,32], index: 6, kind: input, shape index: {}]   ;;  %s3680_s7 = inlined_call_operand.vmem [shape: f32[32,1], index: 7, kind: input, shape index: {}]   ;;  %s3681_s8 = inlined_call_operand.vmem [shape: bf16[9,2,32], index: 8, kind: input, shape index: {}]   ;;  %s3682_s9 = inlined_call_operand.vmem [shape: f32[2,1], index: 9, kind: input, shape index: {}]   ;;  %s3683_s10 = inlined_call_operand.hbm [shape: f32[2,4,256], index: 10, kind: output, shape index: {}]  }
   0x1   :  { %3753 = sst [smem:[#allocation26_spill]] %s3673_s0 }
   0x2   :  { %15 = vsyncpa [#allocation3], 0 }
   0x3   :  { %17 = vsyncpa [#allocation3 + $0x1], 0  ;;  %s2596_s13 = smov 0   ;;  %s2598_s14 = smov 0  }
   0x4   :  { %s2600_s15 = smov 0   ;;  %s2602_s16 = smov 0  }
   0x5 LB: > { %s2617_s17 = sadd.s32 4294967295, %s2528_s16   ;;  %s2319_s18 = sadd.s32 4294967294, %s2528_s16   ;;  %s2528_s16 = sphi %s2602_s16, %s3859_s16   ;;  %s2524_s15 = sphi %s2600_s15, %s3858_s15   ;;  %s2520_s14 = sphi %s2598_s14, %s3857_s14   ;;  %s2516_s13 = sphi %s2596_s13, %s3856_s13  }
   0x6   : > { %s2621_s19 = sadd.s32 1, %s2528_s16   ;;  %s245_s20 = sadd.s32 1, %s2524_s15 }
   0x7   : > { %s242_s21 = ssub.s32 %s2528_s16, %s2621_s19  ;;  %p255_p0 = scmp.ne.s32.totalorder %s2524_s15, %s2520_s14 }
   0x8   : > { %p243_p1 = scmp.eq.s32.totalorder %s242_s21, 0  ;;  %p256_p2 = scmp.eq.s32.totalorder %s2617_s17, 1 }
   0x9   : > { %p261_p3 = scmp.ne.s32.totalorder %s2520_s14, %s2516_s13  ;;  %p262_p4 = scmp.eq.s32.totalorder %s2319_s18, 1 }
   0xa   : > { %s2632_s22 = scalar_select %p243_p1, %s2524_s15, %s245_s20  }
   0xb   : > { %p2634_p5 = por %p256_p2, %p255_p0  ;;  %p2638_p6 = por %p262_p4, %p261_p3 }
   0xc   : > { %p2322_p7 = scmp.ge.s32.totalorder %s2528_s16, 1  ;;  %p315_p8 = scmp.lt.s32.totalorder %s2528_s16, 3 }
   0xe   : > { %p316_p9 = pnand %p2322_p7, %p315_p8 }
  0x10   : > { %319 = sbr.rel (%p316_p9) target bundleno = 1434 (0x59a), region = 60 }
  0x15   : > { %v364_v0 = vld [vmem:[%s3675_s2] sm:$0xf]  ;;  %v3698_v1 = vmov 0   ;;  %p353_p10 = scmp.lt.s32.totalorder %s2617_s17, 1  ;;  %v2531_v2 = vmov 839922192   ;;  %v431_v4 = vlaneseq }
  0x16   : > { %2444 = vset.pattern.permute.xlu0 %v3698_v1  ;;  %485 = vmatprep.mubr.bf16.mxu0 %v3698_v1  ;;  %v429_v3 = vunpack.c.l.s4 %v2531_v2  ;;  %s3756_s0 = sld [smem:[#allocation26_spill]]  ;;  %vm446_vm0 = vcmask 1041408   ;;  %v365_v16 = vld [vmem:[%s3676_s3] sm:$0x3]  ;;  %vm442_vm1 = vcmask 31744   ;;  %s2532_s20 = smov 16  }
  0x17   : > { %426 = vperm.xlu0 %2444, %v364_v0   ;;  %590 = vmatprep.mubr.bf16.mxu1 %v3698_v1  ;;  %s354_s27 = scalar_select %p353_p10, %s2617_s17, 1  ;;  %v2654_v6 = vshrl.u32 %v431_v4, 7  ;;  %v405_v21 = vld [vmem:[%s3678_s5 + $0x18] sm:$0xff]  ;;  %v403_v22 = vld [vmem:[%s3678_s5 + $0x8] sm:$0xff]  ;;  %v404_v25 = vld [vmem:[%s3678_s5 + $0x10] sm:$0xff]  ;;  %v2727_v29 = vand.u32 127, %v431_v4 }
  0x18   : > { %2445 = vset.pattern.permute.xlu1 %v3698_v1  ;;  %v430_v5 = vunpack.c.0.s8 %v429_v3  ;;  %s3696_s21 = smov 17   ;;  %s3692_s25 = smov 15   ;;  %v413_v23 = vld [vmem:[%s3680_s7 + $0x18] sm:$0xff]  ;;  %v411_v24 = vld [vmem:[%s3680_s7 + $0x8] sm:$0xff]  ;;  %v402_v26 = vld [vmem:[%s3678_s5] sm:$0xff]  ;;  %vm551_vm4 = vcmask 1040384  }
  0x19   : > { %s2393_s28 = sshll.u32 %s354_s27, 3  ;;  %s3688_s26 = smov 1   ;;  %v412_v27 = vld [vmem:[%s3680_s7 + $0x10] sm:$0xff]  ;;  %v410_v28 = vld [vmem:[%s3680_s7] sm:$0xff]  ;;  %3759 = vst [vmem:[#allocation7_spill] sm:$0xff] %v2727_v29  ;;  %v524_v30 = vsub.s32 1, %v2654_v6 }
  0x1a   : > { %v433_v7 = vsub.s32 %v430_v5, %v2654_v6  ;;  %s3686_s27 = smov 127   ;;  %s3690_s29 = smov 112   ;;  %v2733_v31 = vld [vmem:[%s3674_s1] sm:$0xff]  ;;  %v2738_v32 = vld [vmem:[%s3674_s1 + $0x8] sm:$0xff]  ;;  %vm519_vm2 = vcmp.lt.s32.totalorder %v2727_v29, 16  ;;  %v505_v35 = vsub.s32 0, %v2654_v6 }
  0x1b   : > { %s3694_s30 = smov 111   ;;  %v2742_v34 = vrot.slane %v2733_v31, %v524_v30  ;;  %v2746_v36 = vrot.slane %v2738_v32, %v524_v30  ;;  %vm500_vm3 = vcmp.lt.s32.totalorder %v2727_v29, 17  ;;  %v695_v40 = vsub.s32 2, %v2654_v6  ;;  %v2446_v58 = vld [vmem:[%s3677_s4 + $0x10] sm:$0xff]  }
  0x1c   : > { %s357_s11 = scalar_lea.vmem %s3756_s0, %s2393_s28  ;;  %s3684_s28 = smov 113   ;;  %v2756_v43 = vrot.slane %v2733_v31, %v505_v35  ;;  %v2759_v44 = vrot.slane %v2738_v32, %v505_v35  ;;  %vm690_vm5 = vcmp.lt.s32.totalorder %v2727_v29, 15  ;;  %v797_v52 = vsub.s32 3, %v2654_v6 }
  0x1d   : > { %v359_v9 = vld [vmem:[%s357_s11] sm:$0xff]  ;;  %3760 = vst [vmem:[#allocation8_spill] sm:$0xff] %v2742_v34  ;;  %3761 = vst [vmem:[#allocation9_spill] sm:$0xff] %v2746_v36  ;;  %v2768_v51 = vrot.slane %v2733_v31, %v695_v40  ;;  %v2776_v57 = vrot.slane %v2738_v32, %v695_v40  ;;  %vm544_vm6 = vcmask 15360   ;;  %vm792_vm7 = vcmp.lt.s32.totalorder %v2727_v29, 1  ;;  %s3789_s11 = smov 111  }
  0x1e   : > { %3762 = vst [vmem:[#allocation10_spill] sm:$0xff] %v2756_v43  ;;  %3763 = vst [vmem:[#allocation11_spill] sm:$0xff] %v2759_v44  ;;  %v2787_v0 = vrot.slane %v2733_v31, %v797_v52  ;;  %v984_v2 = vsub.s32 5, %v2654_v6  ;;  %vm979_vm8 = vcmp.lt.s32.totalorder %v2727_v29, 127  ;;  %vm1081_vm9 = vcmp.lt.s32.totalorder %v2727_v29, 113 }
  0x1f   : > { %3764 = vst [vmem:[#allocation12_spill] sm:$0xff] %v2768_v51  ;;  %3765 = vst [vmem:[#allocation13_spill] sm:$0xff] %v2776_v57  ;;  %v1188_v40 = vsub.s32 7, %v2654_v6  ;;  %vm1183_vm10 = vcmp.lt.s32.totalorder %v2727_v29, 112  ;;  %vm1285_vm11 = vcmp.lt.s32.totalorder %v2727_v29, 111  ;;  %vm1453_vm12 = vcmask 261120  }
  0x20   : > { %3766 = vst [vmem:[#allocation14_spill] sm:$0xff] %v2787_v0 }
  0x92   : > { %v427_v8 = vpop.permute.xlu0 %426 }
  0x93   : > { %v434_v10 = vrot.slane %v427_v8, %v433_v7  ;;  %v2796_v8 = vrot.slane %v2738_v32, %v797_v52 }
  0x95   : > { %v436_v11 = vadd.f32 %v434_v10, %v359_v9  ;;  %3767 = vst [vmem:[#allocation15_spill] sm:$0xff] %v2796_v8  ;;  %v2447_v9 = vld [vmem:[%s3677_s4] sm:$0xff]  }
  0x97   : > { %v438_v12 = vcombine.high %v436_v11, %v436_v11  ;;  %v440_v13 = vpack.c.bf16 %v436_v11, %v436_v11 }
  0x99   : > { %v441_v14 = vpack.c.bf16 %v438_v12, %v438_v12  ;;  %v448_v15 = vsel %vm446_vm0, %v440_v13, 0 }
  0x9b   : > { %2326 = vmatprep.subr.msk.bf16.mxu0 %vm446_vm0, %v441_v14 }
  0x9c   : > { %468 = vmatpush1.bf16.msra.mxu0 %v448_v15 }
  0x9f   : > { %2327 = vmatmul.mubr.msk.bf16.vlgmr.msra.gmra.mxu0 %vm442_vm1, %v365_v16  ;;  %v2810_v16 = vrot.slane %v2738_v32, %v984_v2 }
  0xa0   : > { %665 = vmatprep.mubr.bf16.mxu0 %v3698_v1 }
  0xa1   : > { %3768 = vst [vmem:[#allocation16_spill] sm:$0xff] %v2810_v16 }
 0x15f   : > { %v2666_v17 = vpop.f32.mrf.mxu0 }
 0x160   : > { %3757 = vst [vmem:[#allocation5_spill] sm:$0xff] %v2666_v17  ;;  %515 = vrot.lane.b32.xlu0 %v2666_v17, %s2532_s20 }
 0x161   : > { %v2670_v18 = vpop.f32.mrf.mxu0 }
 0x162   : > { %3758 = vst [vmem:[#allocation6_spill] sm:$0xff] %v2670_v18  ;;  %517 = vrot.lane.b32.xlu1 %v2670_v18, %s2532_s20  ;;  %v891_v13 = vpack.c.bf16 %v2670_v18, %v2670_v18 }
 0x163   : > { %v491_v19 = vpop.f32.mrf.mxu0 }
 0x164   : > { %496 = vrot.lane.b32.xlu0 %v2670_v18, %s3696_s21 }
 0x165   : > { %v492_v20 = vpop.f32.mrf.mxu0 }
 0x166   : > { %494 = vrot.lane.b32.xlu1 %v2666_v17, %s3696_s21  ;;  %s3787_s21 = smov 113  }
 0x168   : > { %688 = vrot.lane.b32.xlu0 %v2670_v18, %s3692_s25 }
 0x16a   : > { %686 = vrot.lane.b32.xlu1 %v2666_v17, %s3692_s25  ;;  %s3785_s25 = smov 1  }
 0x16c   : > { %790 = vrot.lane.b32.xlu0 %v2670_v18, %s3688_s26 }
 0x16e   : > { %788 = vrot.lane.b32.xlu1 %v2666_v17, %s3688_s26  ;;  %s3783_s26 = smov 17  }
 0x170   : > { %977 = vrot.lane.b32.xlu0 %v2670_v18, %s3686_s27 }
 0x172   : > { %975 = vrot.lane.b32.xlu1 %v2666_v17, %s3686_s27  ;;  %s3784_s27 = smov 15  }
 0x174   : > { %1079 = vrot.lane.b32.xlu0 %v2670_v18, %s3684_s28 }
 0x176   : > { %1077 = vrot.lane.b32.xlu1 %v2666_v17, %s3684_s28  ;;  %s350_s28 = sand.u32 1, %s2520_s14  }
 0x177   : > { %s2323_s18 = sshll.u32 %s350_s28, 3 }
 0x178   : > { %1181 = vrot.lane.b32.xlu0 %v2670_v18, %s3690_s29 }
 0x17a   : > { %1179 = vrot.lane.b32.xlu1 %v2666_v17, %s3690_s29  ;;  %s3786_s29 = smov 127  }
 0x17c   : > { %1283 = vrot.lane.b32.xlu0 %v2670_v18, %s3694_s30 }
 0x17e   : > { %1281 = vrot.lane.b32.xlu1 %v2666_v17, %s3694_s30  ;;  %s3788_s30 = smov 112  }
 0x180   : > { %1400 = vperm.xlu0 %2444, %v405_v21  }
 0x182   : > { %1395 = vperm.xlu1 %2445, %v404_v25  }
 0x184   : > { %1390 = vperm.xlu0 %2444, %v403_v22  }
 0x186   : > { %1385 = vperm.xlu1 %2445, %v402_v26  }
 0x188   : > { %1440 = vperm.xlu0 %2444, %v413_v23   ;;  %v2448_v23 = vld [vmem:[%s3677_s4 + $0x18] sm:$0xff]  }
 0x18a   : > { %1435 = vperm.xlu1 %2445, %v412_v27  }
 0x18c   : > { %1430 = vperm.xlu0 %2444, %v411_v24   ;;  %v1086_v24 = vsub.s32 6, %v2654_v6  ;;  %v2853_v6 = vrot.slane %v2738_v32, %v1188_v40 }
 0x18e   : > { %1425 = vperm.xlu1 %2445, %v410_v28   ;;  %v2824_v28 = vrot.slane %v2733_v31, %v984_v2  ;;  %3771 = vst [vmem:[#allocation19_spill] sm:$0xff] %v2853_v6 }
 0x190   : > { %3769 = vst [vmem:[#allocation17_spill] sm:$0xff] %v2824_v28 }
 0x1d2   : > { %v516_v33 = vpop.permute.xlu0 %515 }
 0x1d4   : > { %v518_v37 = vpop.permute.xlu1 %517 }
 0x1d5   : > { %v520_v38 = vsel %vm519_vm2, %v516_v33, %v518_v37  ;;  %v521_v39 = vsel %vm519_vm2, %v518_v37, %v516_v33 }
 0x1d6   : > { %v530_v41 = vmul.f32 %v2742_v34, %v521_v39  ;;  %v497_v42 = vpop.permute.xlu0 %496  ;;  %v531_v45 = vmul.f32 %v2746_v36, %v520_v38  ;;  %v2834_v38 = vrot.slane %v2738_v32, %v1086_v24  ;;  %v2449_v39 = vld [vmem:[%s3677_s4 + $0x8] sm:$0xff]  }
 0x1d8   : > { %v495_v46 = vpop.permute.xlu1 %494  ;;  %v533_v47 = vpack.c.bf16 %v531_v45, %v531_v45  ;;  %v532_v48 = vpack.c.bf16 %v530_v41, %v530_v41  ;;  %3770 = vst [vmem:[#allocation18_spill] sm:$0xff] %v2834_v38 }
 0x1d9   : > { %v501_v49 = vsel %vm500_vm3, %v495_v46, %v497_v42  ;;  %v502_v50 = vsel %vm500_vm3, %v497_v42, %v495_v46 }
 0x1da   : > { %v511_v53 = vmul.f32 %v2756_v43, %v502_v50  ;;  %v512_v54 = vmul.f32 %v2759_v44, %v501_v49  ;;  %v689_v55 = vpop.permute.xlu0 %688  ;;  %2330 = vmatprep.subr.msk.bf16.mxu1 %vm551_vm4, %v533_v47  ;;  %v553_v56 = vsel %vm551_vm4, %v532_v48, 0  ;;  %v890_v47 = vpack.c.bf16 %v2666_v17, %v2666_v17  ;;  %v2450_v50 = vld [vmem:[%s3677_s4 + $0x20] sm:$0xff]  }
 0x1db   : > { %573 = vmatpush1.bf16.msra.mxu1 %v553_v56 }
 0x1dc   : > { %v513_v59 = vpack.c.bf16 %v511_v53, %v511_v53  ;;  %v514_v60 = vpack.c.bf16 %v512_v54, %v512_v54  ;;  %v687_v61 = vpop.permute.xlu1 %686  ;;  %v909_v32 = vsel %vm551_vm4, %v890_v47, 0 }
 0x1dd   : > { %v691_v62 = vsel %vm690_vm5, %v687_v61, %v689_v55  ;;  %v692_v63 = vsel %vm690_vm5, %v689_v55, %v687_v61  ;;  %v2870_v61 = vrot.slane %v2733_v31, %v1086_v24  ;;  %v2456_v24 = vld [vmem:[%s3677_s4 + $0x48] sm:$0xff]  }
 0x1de   : > { %v701_v3 = vmul.f32 %v2768_v51, %v692_v63  ;;  %v702_v4 = vmul.f32 %v2776_v57, %v691_v62  ;;  %v791_v5 = vpop.permute.xlu0 %790  ;;  %2331 = vmatmul.mubr.msk.bf16.vlgmr.msra.gmra.mxu1 %vm544_vm6, %v2446_v58  ;;  %2335 = vmatprep.subr.msk.bf16.mxu0 %vm551_vm4, %v514_v60  ;;  %v628_v7 = vsel %vm551_vm4, %v513_v59, 0  ;;  %v2451_v59 = vld [vmem:[%s3677_s4 + $0x30] sm:$0xff]   ;;  %v2452_v63 = vld [vmem:[%s3677_s4 + $0x28] sm:$0xff]  }
 0x1df   : > { %648 = vmatpush1.bf16.msra.mxu0 %v628_v7  ;;  %600 = vmatprep.mubr.bf16.mxu1 %v3698_v1  ;;  %3772 = vst [vmem:[#allocation20_spill] sm:$0xff] %v2870_v61 }
 0x1e0   : > { %v703_v10 = vpack.c.bf16 %v701_v3, %v701_v3  ;;  %v704_v11 = vpack.c.bf16 %v702_v4, %v702_v4  ;;  %v789_v12 = vpop.permute.xlu1 %788 }
 0x1e1   : > { %v793_v14 = vsel %vm792_vm7, %v789_v12, %v791_v5  ;;  %v794_v15 = vsel %vm792_vm7, %v791_v5, %v789_v12  ;;  %v2884_v5 = vrot.slane %v2733_v31, %v1188_v40  ;;  %v2460_v40 = vld [vmem:[%s3677_s4 + $0x68] sm:$0xff]  }
 0x1e2   : > { %v803_v19 = vmul.f32 %v2787_v0, %v794_v15  ;;  %v804_v20 = vmul.f32 %v2796_v8, %v793_v14  ;;  %v978_v21 = vpop.permute.xlu0 %977  ;;  %2336 = vmatmul.mubr.msk.bf16.vlgmr.msra.gmra.mxu0 %vm544_vm6, %v2447_v9  ;;  %2340 = vmatprep.subr.msk.bf16.mxu1 %vm551_vm4, %v704_v11  ;;  %v722_v22 = vsel %vm551_vm4, %v703_v10, 0  ;;  %v2453_v9 = vld [vmem:[%s3677_s4 + $0x38] sm:$0xff]   ;;  %v2454_v15 = vld [vmem:[%s3677_s4 + $0x40] sm:$0xff]  }
 0x1e3   : > { %742 = vmatpush1.bf16.msra.mxu1 %v722_v22  ;;  %675 = vmatprep.mubr.bf16.mxu0 %v3698_v1  ;;  %3773 = vst [vmem:[#allocation21_spill] sm:$0xff] %v2884_v5  ;;  %v2369_v11 = vld [vmem:[%s3674_s1 + $0x18] ss:$0 sm:$0xff]  ;;  %v2455_v22 = vld [vmem:[%s3677_s4 + $0x50] sm:$0xff]  }
 0x1e4   : > { %v805_v25 = vpack.c.bf16 %v803_v19, %v803_v19  ;;  %v806_v26 = vpack.c.bf16 %v804_v20, %v804_v20  ;;  %v976_v27 = vpop.permute.xlu1 %975  ;;  %2350 = vmatprep.subr.msk.bf16.mxu1 %vm551_vm4, %v891_v13 }
 0x1e5   : > { %v981_v30 = vsel %vm979_vm8, %v978_v21, %v976_v27  ;;  %v980_v41 = vsel %vm979_vm8, %v976_v27, %v978_v21 }
 0x1e6   : > { %v991_v33 = vmul.f32 %v2810_v16, %v981_v30  ;;  %v1080_v35 = vpop.permute.xlu0 %1079  ;;  %2332 = vmatmul.mubr.msk.bf16.gmra.mxu1 %vm544_vm6, %v2448_v23  ;;  %2345 = vmatprep.subr.msk.bf16.mxu0 %vm551_vm4, %v806_v26  ;;  %v824_v37 = vsel %vm551_vm4, %v805_v25, 0  ;;  %v990_v48 = vmul.f32 %v2824_v28, %v980_v41  ;;  %v2368_v25 = vld [vmem:[%s3674_s1 + $0x10] ss:$0 sm:$0xff]  ;;  %v2457_v30 = vld [vmem:[%s3677_s4 + $0x58] sm:$0xff]  }
 0x1e7   : > { %844 = vmatpush1.bf16.msra.mxu0 %v824_v37  ;;  %759 = vmatprep.mubr.bf16.mxu1 %v3698_v1  ;;  %v2461_v41 = vld [vmem:[%s3677_s4 + $0x78] sm:$0xff]  }
 0x1e8   : > { %v993_v42 = vpack.c.bf16 %v991_v33, %v991_v33  ;;  %v1078_v45 = vpop.permute.xlu1 %1077  ;;  %v992_v56 = vpack.c.bf16 %v990_v48, %v990_v48 }
 0x1e9   : > { %v1083_v46 = vsel %vm1081_vm9, %v1080_v35, %v1078_v45  ;;  %v1082_v2 = vsel %vm1081_vm9, %v1078_v45, %v1080_v35  ;;  %v2458_v35 = vld [vmem:[%s3677_s4 + $0x60] sm:$0xff]   ;;  %v2463_v45 = vld [vmem:[%s3677_s4 + $0x88] sm:$0xff]  }
 0x1ea   : > { %v1093_v49 = vmul.f32 %v2834_v38, %v1083_v46  ;;  %2337 = vmatmul.mubr.msk.bf16.gmra.mxu0 %vm544_vm6, %v2449_v39  ;;  %2355 = vmatprep.subr.msk.bf16.mxu0 %vm551_vm4, %v993_v42  ;;  %v1182_v53 = vpop.permute.xlu0 %1181  ;;  %v1011_v62 = vsel %vm551_vm4, %v992_v56, 0  ;;  %v1092_v4 = vmul.f32 %v2870_v61, %v1082_v2  ;;  %v2459_v39 = vld [vmem:[%s3677_s4 + $0x70] sm:$0xff]   ;;  %v2462_v42 = vld [vmem:[%s3677_s4 + $0x80] sm:$0xff]  }
 0x1eb   : > { %861 = vmatprep.mubr.bf16.mxu0 %v3698_v1 }
 0x1ec   : > { %v1095_v52 = vpack.c.bf16 %v1093_v49, %v1093_v49  ;;  %v1180_v54 = vpop.permute.xlu1 %1179  ;;  %v1094_v31 = vpack.c.bf16 %v1092_v4, %v1092_v4 }
 0x1ed   : > { %v1185_v55 = vsel %vm1183_vm10, %v1182_v53, %v1180_v54  ;;  %v1184_v10 = vsel %vm1183_vm10, %v1180_v54, %v1182_v53 }
 0x1ee   : > { %v1195_v58 = vmul.f32 %v2853_v6, %v1185_v55  ;;  %2341 = vmatmul.mubr.msk.bf16.vlgmr.msra.gmra.mxu1 %vm544_vm6, %v2450_v50  ;;  %v1284_v7 = vpop.permute.xlu0 %1283  ;;  %v1194_v13 = vmul.f32 %v2884_v5, %v1184_v10  ;;  %v1113_v21 = vsel %vm551_vm4, %v1094_v31, 0 }
 0x1ef   : > { %929 = vmatpush1.bf16.msra.mxu1 %v909_v32  ;;  %769 = vmatprep.mubr.bf16.mxu1 %v3698_v1 }
 0x1f0   : > { %v1197_v60 = vpack.c.bf16 %v1195_v58, %v1195_v58  ;;  %2360 = vmatprep.subr.msk.bf16.mxu1 %vm551_vm4, %v1095_v52  ;;  %v1282_v3 = vpop.permute.xlu1 %1281  ;;  %v1196_v19 = vpack.c.bf16 %v1194_v13, %v1194_v13 }
 0x1f1   : > { %v1287_v12 = vsel %vm1285_vm11, %v1284_v7, %v1282_v3  ;;  %v1286_v26 = vsel %vm1285_vm11, %v1282_v3, %v1284_v7 }
 0x1f2   : > { %2346 = vmatmul.mubr.msk.bf16.vlgmr.msra.gmra.mxu0 %vm544_vm6, %v2451_v59  ;;  %v1297_v14 = vmul.f32 %v2369_v11, %v1287_v12  ;;  %v1215_v23 = vsel %vm551_vm4, %v1196_v19, 0  ;;  %v1296_v27 = vmul.f32 %v2368_v25, %v1286_v26 }
 0x1f3   : > { %1031 = vmatpush1.bf16.msra.mxu0 %v1011_v62  ;;  %871 = vmatprep.mubr.bf16.mxu0 %v3698_v1 }
 0x1f4   : > { %2365 = vmatprep.subr.msk.bf16.mxu0 %vm551_vm4, %v1197_v60  ;;  %v1299_v20 = vpack.c.bf16 %v1297_v14, %v1297_v14  ;;  %v1298_v33 = vpack.c.bf16 %v1296_v27, %v1296_v27 }
 0x1f6   : > { %2342 = vmatmul.mubr.msk.bf16.gmra.mxu1 %vm544_vm6, %v2452_v63  ;;  %v1317_v37 = vsel %vm551_vm4, %v1298_v33, 0 }
 0x1f7   : > { %946 = vmatprep.mubr.bf16.mxu1 %v3698_v1 }
 0x1fa   : > { %2347 = vmatmul.mubr.msk.bf16.gmra.mxu0 %vm544_vm6, %v2453_v9 }
 0x1fb   : > { %1048 = vmatprep.mubr.bf16.mxu0 %v3698_v1 }
 0x1fe   : > { %2351 = vmatmul.mubr.msk.bf16.vlgmr.msra.gmra.mxu1 %vm544_vm6, %v2454_v15 }
 0x1ff   : > { %1133 = vmatpush1.bf16.msra.mxu1 %v1113_v21  ;;  %956 = vmatprep.mubr.bf16.mxu1 %v3698_v1 }
 0x200   : > { %2372 = vmatprep.subr.msk.bf16.mxu1 %vm551_vm4, %v1299_v20 }
 0x202   : > { %2356 = vmatmul.mubr.msk.bf16.vlgmr.msra.gmra.mxu0 %vm544_vm6, %v2455_v22 }
 0x203   : > { %1235 = vmatpush1.bf16.msra.mxu0 %v1215_v23  ;;  %1058 = vmatprep.mubr.bf16.mxu0 %v3698_v1 }
 0x206   : > { %2352 = vmatmul.mubr.msk.bf16.gmra.mxu1 %vm544_vm6, %v2456_v24 }
 0x207   : > { %1150 = vmatprep.mubr.bf16.mxu1 %v3698_v1 }
 0x20a   : > { %2357 = vmatmul.mubr.msk.bf16.gmra.mxu0 %vm544_vm6, %v2457_v30 }
 0x20b   : > { %1252 = vmatprep.mubr.bf16.mxu0 %v3698_v1 }
 0x20e   : > { %2361 = vmatmul.mubr.msk.bf16.vlgmr.msra.gmra.mxu1 %vm544_vm6, %v2458_v35 }
 0x20f   : > { %1337 = vmatpush1.bf16.msra.mxu1 %v1317_v37  ;;  %1160 = vmatprep.mubr.bf16.mxu1 %v3698_v1 }
 0x212   : > { %2366 = vmatmul.mubr.msk.bf16.vlgmr.msra.gmra.mxu0 %vm544_vm6, %v2459_v39 }
 0x213   : > { %1262 = vmatprep.mubr.bf16.mxu0 %v3698_v1 }
 0x216   : > { %2362 = vmatmul.mubr.msk.bf16.gmra.mxu1 %vm544_vm6, %v2460_v40 }
 0x217   : > { %1354 = vmatprep.mubr.bf16.mxu1 %v3698_v1 }
 0x21a   : > { %2367 = vmatmul.mubr.msk.bf16.gmra.mxu0 %vm544_vm6, %v2461_v41 }
 0x21b   : > { %1492 = vmatprep.mubr.bf16.mxu0 %v3698_v1 }
 0x21e   : > { %2373 = vmatmul.mubr.msk.bf16.vlgmr.msra.gmra.mxu1 %vm544_vm6, %v2462_v42 }
 0x21f   : > { %1364 = vmatprep.mubr.bf16.mxu1 %v3698_v1 }
 0x226   : > { %2374 = vmatmul.mubr.msk.bf16.gmra.mxu1 %vm544_vm6, %v2463_v45 }
 0x227   : > { %1628 = vmatprep.mubr.bf16.mxu1 %v3698_v1 }
 0x29e   : > { %v592_v46 = vpop.f32.mrf.mxu1 }
 0x2a0   : > { %v2960_v47 = vpop.f32.mrf.mxu1 }
 0x2a2   : > { %v596_v48 = vpop.f32.mrf.mxu1  ;;  %v667_v49 = vpop.f32.mrf.mxu0 }
 0x2a3   : > { %v668_v5 = vadd.f32 %v667_v49, %v592_v46 }
 0x2a4   : > { %v2962_v50 = vpop.f32.mrf.mxu1  ;;  %v2964_v52 = vpop.f32.mrf.mxu0 }
 0x2a6   : > { %v2966_v53 = vpop.f32.mrf.mxu1  ;;  %v671_v54 = vpop.f32.mrf.mxu0 }
 0x2a7   : > { %v672_v0 = vadd.f32 %v671_v54, %v596_v48 }
 0x2a8   : > { %v604_v55 = vpop.f32.mrf.mxu1  ;;  %v673_v56 = vpop.f32.mrf.mxu0 }
 0x2a9   : > { %v674_v46 = vadd.f32 %v673_v56, %v2962_v50 }
 0x2aa   : > { %v2968_v58 = vpop.f32.mrf.mxu1  ;;  %v677_v32 = vpop.f32.mrf.mxu0 }
 0x2ab   : > { %v678_v48 = vadd.f32 %v677_v32, %v2966_v53 }
 0x2ac   : > { %v2970_v59 = vpop.f32.mrf.mxu1  ;;  %v679_v60 = vpop.f32.mrf.mxu0 }
 0x2ae   : > { %v2972_v62 = vpop.f32.mrf.mxu0  ;;  %v761_v63 = vpop.f32.mrf.mxu1 }
 0x2af   : > { %v780_v16 = vadd.f32 %v761_v63, %v668_v5  ;;  %v680_v5 = vadd.f32 %v679_v60, %v604_v55 }
 0x2b0   : > { %v2974_v2 = vpop.f32.mrf.mxu0  ;;  %v2976_v3 = vpop.f32.mrf.mxu1 }
 0x2b2   : > { %v765_v4 = vpop.f32.mrf.mxu1  ;;  %v863_v7 = vpop.f32.mrf.mxu0 }
 0x2b3   : > { %v882_v57 = vadd.f32 %v863_v7, %v780_v16  ;;  %v782_v43 = vadd.f32 %v765_v4, %v672_v0  ;;  %v670_v16 = vadd.f32 %v2964_v52, %v2960_v47  ;;  %v3020_v4 = vpop.permute.xlu0 %1400 }
 0x2b4   : > { %v767_v9 = vpop.f32.mrf.mxu1  ;;  %v2978_v10 = vpop.f32.mrf.mxu0 }
 0x2b5   : > { %v783_v54 = vadd.f32 %v767_v9, %v674_v46 }
 0x2b6   : > { %v771_v11 = vpop.f32.mrf.mxu1  ;;  %v867_v12 = vpop.f32.mrf.mxu0 }
 0x2b8   : > { %v773_v31 = vpop.f32.mrf.mxu1  ;;  %v869_v13 = vpop.f32.mrf.mxu0 }
 0x2b9   : > { %v885_v47 = vadd.f32 %v869_v13, %v783_v54 }
 0x2ba   : > { %v775_v14 = vpop.f32.mrf.mxu1  ;;  %v2980_v15 = vpop.f32.mrf.mxu0 }
 0x2bc   : > { %v2982_v19 = vpop.f32.mrf.mxu1  ;;  %v875_v20 = vpop.f32.mrf.mxu0 }
 0x2be   : > { %v2984_v21 = vpop.f32.mrf.mxu0  ;;  %v948_v22 = vpop.f32.mrf.mxu1 }
 0x2bf   : > { %v967_v36 = vadd.f32 %v948_v22, %v882_v57 }
 0x2c0   : > { %v2986_v23 = vpop.f32.mrf.mxu0  ;;  %v2988_v24 = vpop.f32.mrf.mxu1 }
 0x2c2   : > { %v952_v25 = vpop.f32.mrf.mxu1  ;;  %v1050_v26 = vpop.f32.mrf.mxu0 }
 0x2c4   : > { %v954_v27 = vpop.f32.mrf.mxu1  ;;  %v2990_v30 = vpop.f32.mrf.mxu0 }
 0x2c6   : > { %v2992_v33 = vpop.f32.mrf.mxu1  ;;  %v1054_v35 = vpop.f32.mrf.mxu0 }
 0x2c8   : > { %v960_v37 = vpop.f32.mrf.mxu1  ;;  %v2994_v39 = vpop.f32.mrf.mxu0 }
 0x2ca   : > { %v2996_v40 = vpop.f32.mrf.mxu1  ;;  %v2998_v41 = vpop.f32.mrf.mxu0 }
 0x2cc   : > { %v3000_v42 = vpop.f32.mrf.mxu1  ;;  %v3002_v45 = vpop.f32.mrf.mxu0 }
 0x2cd   : > { %3774 = vst [vmem:[#allocation22_spill] sm:$0xff] %v3000_v42  ;;  %v3014_v42 = vpop.permute.xlu1 %1395 }
 0x2ce   : > { %v3004_v1 = vpop.f32.mrf.mxu0  ;;  %v1152_v18 = vpop.f32.mrf.mxu1 }
 0x2cf   : > { %3775 = vst [vmem:[#allocation23_spill] sm:$0xff] %v3004_v1  ;;  %v884_v1 = vadd.f32 %v867_v12, %v782_v43  ;;  %v785_v43 = vadd.f32 %v773_v31, %v680_v5 }
 0x2d0   : > { %v3006_v17 = vpop.f32.mrf.mxu0  ;;  %v3008_v6 = vpop.f32.mrf.mxu1 }
 0x2d1   : > { %3776 = vst [vmem:[#allocation24_spill] sm:$0xff] %v3006_v17  ;;  %3777 = vst [vmem:[#allocation25_spill] sm:$0xff] %v3008_v6  ;;  %v1069_v17 = vadd.f32 %v1050_v26, %v967_v36  ;;  %v969_v63 = vadd.f32 %v952_v25, %v884_v1  ;;  %v682_v36 = vadd.f32 %v2972_v62, %v2968_v58  ;;  %v1386_v60 = vpop.permute.xlu1 %1385 }
 0x2d2   : > { %v1156_v38 = vpop.f32.mrf.mxu1  ;;  %v1254_v61 = vpop.f32.mrf.mxu0  ;;  %v684_v1 = vadd.f32 %v2974_v2, %v2970_v59  ;;  %v887_v55 = vadd.f32 %v875_v20, %v785_v43 }
 0x2d3   : > { %v1171_v6 = vadd.f32 %v1152_v18, %v1069_v17  ;;  %v1071_v7 = vadd.f32 %v1054_v35, %v969_v63  ;;  %v781_v17 = vadd.f32 %v2976_v3, %v670_v16  ;;  %v784_v18 = vadd.f32 %v771_v11, %v678_v48 }
 0x2d4   : > { %v1158_v28 = vpop.f32.mrf.mxu1  ;;  %v3010_v8 = vpop.f32.mrf.mxu0  ;;  %v786_v53 = vadd.f32 %v775_v14, %v682_v36  ;;  %v787_v62 = vadd.f32 %v2982_v19, %v684_v1  ;;  %v972_v2 = vadd.f32 %v960_v37, %v887_v55  ;;  %v3778_v25 = vld [vmem:[#allocation22_spill] sm:$0xff] }
 0x2d5   : > { %v1273_v50 = vadd.f32 %v1254_v61, %v1171_v6  ;;  %v1173_v56 = vadd.f32 %v1156_v38, %v1071_v7  ;;  %v883_v9 = vadd.f32 %v2978_v10, %v781_v17  ;;  %v886_v58 = vadd.f32 %v2980_v15, %v784_v18  ;;  %v1391_v14 = vpop.permute.xlu0 %1390 }
 0x2d6   : > { %v3012_v51 = vpop.f32.mrf.mxu1  ;;  %v1258_v44 = vpop.f32.mrf.mxu0  ;;  %v970_v6 = vadd.f32 %v954_v27, %v885_v47  ;;  %v888_v59 = vadd.f32 %v2984_v21, %v786_v53  ;;  %v889_v11 = vadd.f32 %v2986_v23, %v787_v62  ;;  %v1074_v19 = vadd.f32 %v3002_v45, %v972_v2 }
 0x2d7   : > { %v1275_v3 = vadd.f32 %v1258_v44, %v1173_v56  ;;  %v968_v31 = vadd.f32 %v2988_v24, %v883_v9  ;;  %v971_v38 = vadd.f32 %v2992_v33, %v886_v58  ;;  %v3779_v33 = vld [vmem:[#allocation23_spill] sm:$0xff] }
 0x2d8   : > { %v1164_v34 = vpop.f32.mrf.mxu1  ;;  %v1260_v29 = vpop.f32.mrf.mxu0  ;;  %v1072_v13 = vadd.f32 %v2994_v39, %v970_v6  ;;  %v973_v15 = vadd.f32 %v2996_v40, %v888_v59  ;;  %v974_v23 = vadd.f32 %v3778_v25, %v889_v11  ;;  %v3780_v46 = vld [vmem:[#allocation24_spill] sm:$0xff]  ;;  %v3781_v40 = vld [vmem:[#allocation25_spill] sm:$0xff] }
 0x2d9   : > { %v1070_v21 = vadd.f32 %v2990_v30, %v968_v31  ;;  %v1073_v44 = vadd.f32 %v2998_v41, %v971_v38  ;;  %v1176_v37 = vadd.f32 %v1164_v34, %v1074_v19  ;;  %v2464_v38 = vld [vmem:[%s3679_s6] sm:$0xff]  }
 0x2da   : > { %v1166_v49 = vpop.f32.mrf.mxu1  ;;  %v1264_v0 = vpop.f32.mrf.mxu0  ;;  %v1174_v26 = vadd.f32 %v1158_v28, %v1072_v13  ;;  %v1075_v35 = vadd.f32 %v3779_v33, %v973_v15  ;;  %v1076_v5 = vadd.f32 %v3780_v46, %v974_v23 }
 0x2db   : > { %v1172_v63 = vadd.f32 %v3781_v40, %v1070_v21  ;;  %v1175_v45 = vadd.f32 %v3012_v51, %v1073_v44  ;;  %v3061_v13 = vpop.permute.xlu0 %1440 }
 0x2dc   : > { %v1168_v57 = vpop.f32.mrf.mxu1  ;;  %v1266_v61 = vpop.f32.mrf.mxu0  ;;  %v1276_v16 = vadd.f32 %v1260_v29, %v1174_v26  ;;  %v1177_v30 = vadd.f32 %v1166_v49, %v1075_v35 }
 0x2dd   : > { %v1278_v54 = vadd.f32 %v1266_v61, %v1176_v37  ;;  %v1274_v28 = vadd.f32 %v3010_v8, %v1172_v63  ;;  %v1277_v43 = vadd.f32 %v1264_v0, %v1175_v45  ;;  %v1178_v7 = vadd.f32 %v1168_v57, %v1076_v5 }
 0x2de   : > { %v1356_v52 = vpop.f32.mrf.mxu1  ;;  %v1268_v24 = vpop.f32.mrf.mxu0 }
 0x2df   : > { %v1375_v32 = vadd.f32 %v1356_v52, %v1273_v50  ;;  %v1279_v34 = vadd.f32 %v1268_v24, %v1177_v30 }
 0x2e0   : > { %v1358_v12 = vpop.f32.mrf.mxu1  ;;  %v1270_v50 = vpop.f32.mrf.mxu0 }
 0x2e1   : > { %v1403_v20 = vadd.f32 %v1386_v60, %v1375_v32  ;;  %v1280_v55 = vadd.f32 %v1270_v50, %v1178_v7  ;;  %v1376_v51 = vadd.f32 %v1358_v12, %v1274_v28  ;;  %v423_v50 = vld [vmem:[%s3682_s9] sm:$0x3] }
 0x2e2   : > { %v1360_v10 = vpop.f32.mrf.mxu1 }
 0x2e3   : > { %v1377_v22 = vadd.f32 %v1360_v10, %v1275_v3  ;;  %v1411_v41 = vmax.f32 %v1403_v20, 0.0  ;;  %v1404_v57 = vadd.f32 %v1386_v60, %v1376_v51  ;;  %v3059_v60 = vpop.permute.xlu1 %1435 }
 0x2e4   : > { %v1362_v27 = vpop.f32.mrf.mxu1 }
 0x2e5   : > { %v1405_v39 = vadd.f32 %v1391_v14, %v1377_v22  ;;  %v1378_v18 = vadd.f32 %v1362_v27, %v1276_v16  ;;  %v1412_v3 = vmax.f32 %v1404_v57, 0.0  ;;  %v1431_v22 = vpop.permute.xlu0 %1430 }
 0x2e6   : > { %v1366_v48 = vpop.f32.mrf.mxu1 }
 0x2e7   : > { %v1413_v36 = vmax.f32 %v1405_v39, 0.0  ;;  %v1379_v52 = vadd.f32 %v1366_v48, %v1277_v43  ;;  %v1406_v49 = vadd.f32 %v1391_v14, %v1378_v18  ;;  %v1426_v10 = vpop.permute.xlu1 %1425 }
 0x2e8   : > { %v1368_v1 = vpop.f32.mrf.mxu1 }
 0x2e9   : > { %v1419_v17 = vpack.c.bf16 %v1413_v36, %v1411_v41  ;;  %v1380_v47 = vadd.f32 %v1368_v1, %v1278_v54  ;;  %v1407_v0 = vadd.f32 %v3014_v42, %v1379_v52  ;;  %v1414_v6 = vmax.f32 %v1406_v49, 0.0 }
 0x2ea   : > { %v1370_v53 = vpop.f32.mrf.mxu1 }
 0x2eb   : > { %v1381_v29 = vadd.f32 %v1370_v53, %v1279_v34  ;;  %v1408_v32 = vadd.f32 %v3014_v42, %v1380_v47  ;;  %v1415_v2 = vmax.f32 %v1407_v0, 0.0  ;;  %v1420_v31 = vpack.c.bf16 %v1414_v6, %v1412_v3 }
 0x2ec   : > { %v1372_v56 = vpop.f32.mrf.mxu1  ;;  %v3782_v42 = vmov 0  }
 0x2ed   : > { %v1409_v9 = vadd.f32 %v3020_v4, %v1381_v29  ;;  %v1382_v8 = vadd.f32 %v1372_v56, %v1280_v55  ;;  %v1416_v61 = vmax.f32 %v1408_v32, 0.0  ;;  %v421_v56 = vld [vmem:[%s3681_s8 + $0x7] sm:$0x1] }
 0x2ef   : > { %v1410_v58 = vadd.f32 %v3020_v4, %v1382_v8  ;;  %v1417_v62 = vmax.f32 %v1409_v9, 0.0  ;;  %v2465_v4 = vld [vmem:[%s3679_s6 + $0x8] sm:$0xff]  }
 0x2f1   : > { %v1418_v59 = vmax.f32 %v1410_v58, 0.0  ;;  %v1421_v11 = vpack.c.bf16 %v1417_v62, %v1415_v2  ;;  %v3791_v62 = vld [vmem:[#allocation8_spill] sm:$0xff] }
 0x2f3   : > { %v1422_v12 = vpack.c.bf16 %v1418_v59, %v1416_v61  ;;  %v3792_v61 = vld [vmem:[#allocation9_spill] sm:$0xff] }
 0x2f5   : > { %1472 = vmatprep.subr.bf16.mxu0 %v1422_v12 }
 0x2f6   : > { %1473 = vmatpush1.bf16.msra.mxu0 %v1421_v11 }
 0x2f7   : > { %1474 = vmatprep.subr.bf16.mxu0 %v1420_v31 }
 0x2fa   : > { %1475 = vmatpush1.bf16.msra.mxu0 %v1419_v17 }
 0x2fd   : > { %2377 = vmatmul.mubr.msk.bf16.vlgmr.msra.gmra.mxu0 %vm1453_vm12, %v2464_v38 }
 0x2fe   : > { %1502 = vmatprep.mubr.bf16.mxu0 %v3782_v42 }
 0x305   : > { %2378 = vmatmul.mubr.msk.bf16.gmra.mxu0 %vm1453_vm12, %v2465_v4 }
 0x306   : > { %1672 = vmatprep.mubr.bf16.mxu0 %v3782_v42 }
 0x3bd   : > { %v1494_v14 = vpop.f32.mrf.mxu0 }
 0x3be   : > { %v1495_v15 = vadd.f32 %v1494_v14, %v1426_v10  ;;  %v3793_v14 = vld [vmem:[#allocation10_spill] sm:$0xff] }
 0x3bf   : > { %v1496_v19 = vpop.f32.mrf.mxu0 }
 0x3c0   : > { %v3063_v20 = vmax.f32 %v1495_v15, 0.0  ;;  %v1497_v23 = vadd.f32 %v1496_v19, %v1426_v10  ;;  %v3794_v19 = vld [vmem:[#allocation11_spill] sm:$0xff] }
 0x3c1   : > { %v1498_v21 = vpop.f32.mrf.mxu0 }
 0x3c2   : > { %v1499_v44 = vadd.f32 %v1498_v21, %v1431_v22  ;;  %1557 = vrot.lane.b32.xlu1 %v3063_v20, %s2532_s20  ;;  %v3093_v24 = vmax.f32 %v1497_v23, 0.0 }
 0x3c3   : > { %v1500_v26 = vpop.f32.mrf.mxu0 }
 0x3c4   : > { %v3067_v25 = vmax.f32 %v1499_v44, 0.0  ;;  %v1501_v27 = vadd.f32 %v1500_v26, %v1431_v22 }
 0x3c5   : > { %v1504_v35 = vpop.f32.mrf.mxu0 }
 0x3c6   : > { %1559 = vrot.lane.b32.xlu0 %v3067_v25, %s2532_s20  ;;  %1521 = vrot.lane.b32.xlu1 %v3063_v20, %s3783_s26  ;;  %v3099_v33 = vmax.f32 %v1501_v27, 0.0  ;;  %v1505_v39 = vadd.f32 %v1504_v35, %v3059_v60 }
 0x3c7   : > { %v1506_v37 = vpop.f32.mrf.mxu0 }
 0x3c8   : > { %v3126_v5 = vmax.f32 %v1505_v39, 0.0  ;;  %v1507_v45 = vadd.f32 %v1506_v37, %v3059_v60 }
 0x3c9   : > { %v1508_v46 = vpop.f32.mrf.mxu0 }
 0x3ca   : > { %1523 = vrot.lane.b32.xlu0 %v3067_v25, %s3783_s26  ;;  %1681 = vrot.lane.b32.xlu1 %v3063_v20, %s3784_s27  ;;  %v1509_v40 = vadd.f32 %v1508_v46, %v3061_v13  ;;  %v3164_v48 = vmax.f32 %v1507_v45, 0.0  ;;  %v3795_v45 = vld [vmem:[#allocation12_spill] sm:$0xff] }
 0x3cb   : > { %v1510_v16 = vpop.f32.mrf.mxu0 }
 0x3cc   : > { %v3133_v63 = vmax.f32 %v1509_v40, 0.0  ;;  %v1511_v30 = vadd.f32 %v1510_v16, %v3061_v13 }
 0x3ce   : > { %1683 = vrot.lane.b32.xlu0 %v3067_v25, %s3784_s27  ;;  %1763 = vrot.lane.b32.xlu1 %v3063_v20, %s3785_s25  ;;  %v3171_v54 = vmax.f32 %v1511_v30, 0.0  ;;  %v3796_v30 = vld [vmem:[#allocation13_spill] sm:$0xff] }
 0x3d2   : > { %1765 = vrot.lane.b32.xlu0 %v3067_v25, %s3785_s25  ;;  %1895 = vrot.lane.b32.xlu1 %v3063_v20, %s3786_s29 }
 0x3d6   : > { %1897 = vrot.lane.b32.xlu0 %v3067_v25, %s3786_s29  ;;  %1977 = vrot.lane.b32.xlu1 %v3063_v20, %s3787_s21 }
 0x3da   : > { %1979 = vrot.lane.b32.xlu0 %v3067_v25, %s3787_s21  ;;  %2059 = vrot.lane.b32.xlu1 %v3063_v20, %s3788_s30 }
 0x3de   : > { %2061 = vrot.lane.b32.xlu0 %v3067_v25, %s3788_s30  ;;  %1565 = vrot.lane.b32.xlu1 %v3093_v24, %s2532_s20 }
 0x3e2   : > { %1567 = vrot.lane.b32.xlu0 %v3099_v33, %s2532_s20  ;;  %1529 = vrot.lane.b32.xlu1 %v3093_v24, %s3783_s26 }
 0x3e6   : > { %1531 = vrot.lane.b32.xlu0 %v3099_v33, %s3783_s26  ;;  %1689 = vrot.lane.b32.xlu1 %v3093_v24, %s3784_s27 }
 0x3ea   : > { %1691 = vrot.lane.b32.xlu0 %v3099_v33, %s3784_s27  ;;  %1771 = vrot.lane.b32.xlu1 %v3093_v24, %s3785_s25 }
 0x3ee   : > { %1773 = vrot.lane.b32.xlu0 %v3099_v33, %s3785_s25  ;;  %1903 = vrot.lane.b32.xlu1 %v3093_v24, %s3786_s29 }
 0x3f2   : > { %1905 = vrot.lane.b32.xlu0 %v3099_v33, %s3786_s29  ;;  %1985 = vrot.lane.b32.xlu1 %v3093_v24, %s3787_s21 }
 0x3f6   : > { %1987 = vrot.lane.b32.xlu0 %v3099_v33, %s3787_s21  ;;  %2067 = vrot.lane.b32.xlu1 %v3093_v24, %s3788_s30 }
 0x3fa   : > { %2069 = vrot.lane.b32.xlu0 %v3099_v33, %s3788_s30  ;;  %1561 = vrot.lane.b32.xlu1 %v3126_v5, %s2532_s20 }
 0x3fe   : > { %1563 = vrot.lane.b32.xlu0 %v3133_v63, %s2532_s20  ;;  %1525 = vrot.lane.b32.xlu1 %v3126_v5, %s3783_s26 }
 0x402   : > { %1527 = vrot.lane.b32.xlu0 %v3133_v63, %s3783_s26  ;;  %1685 = vrot.lane.b32.xlu1 %v3126_v5, %s3784_s27 }
 0x406   : > { %1687 = vrot.lane.b32.xlu0 %v3133_v63, %s3784_s27  ;;  %1767 = vrot.lane.b32.xlu1 %v3126_v5, %s3785_s25 }
 0x40a   : > { %1769 = vrot.lane.b32.xlu0 %v3133_v63, %s3785_s25  ;;  %1899 = vrot.lane.b32.xlu1 %v3126_v5, %s3786_s29 }
 0x40e   : > { %1901 = vrot.lane.b32.xlu0 %v3133_v63, %s3786_s29  ;;  %1981 = vrot.lane.b32.xlu1 %v3126_v5, %s3787_s21 }
 0x412   : > { %1983 = vrot.lane.b32.xlu0 %v3133_v63, %s3787_s21  ;;  %2063 = vrot.lane.b32.xlu1 %v3126_v5, %s3788_s30 }
 0x416   : > { %2065 = vrot.lane.b32.xlu0 %v3133_v63, %s3788_s30  ;;  %2145 = vrot.lane.b32.xlu1 %v3126_v5, %s3789_s11 }
 0x41a   : > { %2147 = vrot.lane.b32.xlu0 %v3133_v63, %s3789_s11  ;;  %1569 = vrot.lane.b32.xlu1 %v3164_v48, %s2532_s20 }
 0x41e   : > { %1571 = vrot.lane.b32.xlu0 %v3171_v54, %s2532_s20  ;;  %1533 = vrot.lane.b32.xlu1 %v3164_v48, %s3783_s26 }
 0x422   : > { %1535 = vrot.lane.b32.xlu0 %v3171_v54, %s3783_s26  ;;  %1693 = vrot.lane.b32.xlu1 %v3164_v48, %s3784_s27  ;;  %s2394_s26 = sshll.u32 %s2617_s17, 7  ;;  %s2540_s17 = smov [#allocation2]  }
 0x423   : > { %s2472_s12 = sshll.u32 %s2540_s17, 4  ;;  %s2473_s12 = int_to_ptr.vmem [resolvable:$false] %s2472_s12 }
 0x426   : > { %1695 = vrot.lane.b32.xlu0 %v3171_v54, %s3784_s27  ;;  %1775 = vrot.lane.b32.xlu1 %v3164_v48, %s3785_s25  ;;  %s352_s27 = scalar_lea.vmem [#allocation2], %s2323_s18  ;;  %s2474_s18 = scalar_lea.vmem %s2473_s12, 256 }
 0x42a   : > { %1777 = vrot.lane.b32.xlu0 %v3171_v54, %s3785_s25  ;;  %2141 = vrot.lane.b32.xlu1 %v3063_v20, %s3789_s11  ;;  %s2260_s25 = sshll.u32 %s352_s27, 4  ;;  %s2261_s25 = int_to_ptr.vmem [resolvable:$true] %s2260_s25 }
 0x42b   : > { %s2468_s20 = scalar_lea.vmem %s2261_s25, 128  ;;  %p2475_p0 = scmp.lt.s32.totalorder %s2261_s25, %s2473_s12 }
 0x42c   : > { %p2469_p11 = scmp.ne.s32.totalorder %s2261_s25, %s2468_s20  ;;  %p2476_p1 = scmp.lt.s32.totalorder %s2474_s18, %s2468_s20 }
 0x42e   : > { %2143 = vrot.lane.b32.xlu0 %v3067_v25, %s3789_s11  ;;  %1907 = vrot.lane.b32.xlu1 %v3164_v48, %s3786_s29  ;;  %p2470_p12 = pnand %p2469_p11, %p2634_p5  ;;  %p2477_p2 = por %p2476_p1, %p2475_p0 }
 0x430   : > { %p2471_p13 = pneg %p2470_p12 }
 0x432   : > { %1909 = vrot.lane.b32.xlu0 %v3171_v54, %s3786_s29  ;;  %1989 = vrot.lane.b32.xlu1 %v3164_v48, %s3787_s21  ;;  %p2478_p3 = pnand %p2477_p2, %p2471_p13 }
 0x434   : > { %v1558_v41 = vpop.permute.xlu1 %1557 }
 0x436   : > { %1991 = vrot.lane.b32.xlu0 %v3171_v54, %s3787_s21  ;;  %2071 = vrot.lane.b32.xlu1 %v3164_v48, %s3788_s30 }
 0x438   : > { %v1560_v36 = vpop.permute.xlu0 %1559  ;;  %v1522_v28 = vpop.permute.xlu1 %1521 }
 0x43a   : > { %2073 = vrot.lane.b32.xlu0 %v3171_v54, %s3788_s30  ;;  %2153 = vrot.lane.b32.xlu1 %v3164_v48, %s3789_s11  ;;  %s2258_s30 = scalar_lea.hbm %s3683_s10, %s2394_s26 }
 0x43c   : > { %v1524_v43 = vpop.permute.xlu0 %1523  ;;  %v1682_v7 = vpop.permute.xlu1 %1681 }
 0x43e   : > { %2155 = vrot.lane.b32.xlu0 %v3171_v54, %s3789_s11  ;;  %2149 = vrot.lane.b32.xlu1 %v3093_v24, %s3789_s11 }
 0x440   : > { %v1684_v1 = vpop.permute.xlu0 %1683  ;;  %v1764_v34 = vpop.permute.xlu1 %1763 }
 0x442   : > { %2151 = vrot.lane.b32.xlu0 %v3099_v33, %s3789_s11  ;;  %2225 = vperm.xlu1 %2445, %v423_v50   ;;  %s2246_s11 = scalar_lea.sflag [#allocation3], %s350_s28 }
 0x444   : > { %v1766_v17 = vpop.permute.xlu0 %1765  ;;  %v1896_v18 = vpop.permute.xlu1 %1895 }
 0x448   : > { %v1898_v47 = vpop.permute.xlu0 %1897  ;;  %v1978_v52 = vpop.permute.xlu1 %1977 }
 0x44c   : > { %v3214_v53 = vpop.permute.xlu0 %1979  ;;  %v3216_v55 = vpop.permute.xlu1 %2059 }
 0x450   : > { %v3218_v51 = vpop.permute.xlu0 %2061  ;;  %v1566_v29 = vpop.permute.xlu1 %1565 }
 0x451   : > { %v1577_v49 = vsel %vm519_vm2, %v1566_v29, %v1558_v41  ;;  %v1573_v32 = vsel %vm519_vm2, %v1558_v41, %v1566_v29 }
 0x452   : > { %v3231_v6 = vmul.f32 %v1577_v49, %v3791_v62  ;;  %v3234_v59 = vmul.f32 %v1573_v32, %v3792_v61 }
 0x454   : > { %v1568_v9 = vpop.permute.xlu0 %1567  ;;  %v1530_v8 = vpop.permute.xlu1 %1529 }
 0x455   : > { %v1574_v0 = vsel %vm519_vm2, %v1560_v36, %v1568_v9  ;;  %v1578_v57 = vsel %vm519_vm2, %v1568_v9, %v1560_v36  ;;  %v1541_v58 = vsel %vm500_vm3, %v1530_v8, %v1522_v28  ;;  %v1537_v12 = vsel %vm500_vm3, %v1522_v28, %v1530_v8  ;;  %v3797_v8 = vld [vmem:[#allocation14_spill] sm:$0xff] }
 0x456   : > { %v3237_v2 = vmul.f32 %v1578_v57, %v3791_v62  ;;  %v3240_v3 = vmul.f32 %v1574_v0, %v3792_v61  ;;  %v3255_v15 = vmul.f32 %v1541_v58, %v3793_v14  ;;  %v3258_v22 = vmul.f32 %v1537_v12, %v3794_v19  ;;  %v3798_v57 = vld [vmem:[#allocation15_spill] sm:$0xff] }
 0x458   : > { %v1532_v31 = vpop.permute.xlu0 %1531  ;;  %v1690_v38 = vpop.permute.xlu1 %1689 }
 0x459   : > { %v1538_v60 = vsel %vm500_vm3, %v1524_v43, %v1532_v31  ;;  %v1542_v13 = vsel %vm500_vm3, %v1532_v31, %v1524_v43  ;;  %v1701_v10 = vsel %vm690_vm5, %v1690_v38, %v1682_v7  ;;  %v1697_v23 = vsel %vm690_vm5, %v1682_v7, %v1690_v38 }
 0x45a   : > { %v3261_v21 = vmul.f32 %v1542_v13, %v3793_v14  ;;  %v3264_v44 = vmul.f32 %v1538_v60, %v3794_v19  ;;  %v3279_v16 = vmul.f32 %v1701_v10, %v3795_v45  ;;  %v3282_v41 = vmul.f32 %v1697_v23, %v3796_v30 }
 0x45c   : > { %v1692_v27 = vpop.permute.xlu0 %1691  ;;  %v1772_v35 = vpop.permute.xlu1 %1771 }
 0x45d   : > { %v1698_v39 = vsel %vm690_vm5, %v1684_v1, %v1692_v27  ;;  %v1702_v46 = vsel %vm690_vm5, %v1692_v27, %v1684_v1  ;;  %v1783_v40 = vsel %vm792_vm7, %v1772_v35, %v1764_v34  ;;  %v1779_v43 = vsel %vm792_vm7, %v1764_v34, %v1772_v35  ;;  %v3799_v35 = vld [vmem:[#allocation17_spill] sm:$0xff] }
 0x45e   : > { %v3285_v36 = vmul.f32 %v1702_v46, %v3795_v45  ;;  %v3288_v28 = vmul.f32 %v1698_v39, %v3796_v30  ;;  %v3305_v0 = vmul.f32 %v1783_v40, %v3797_v8  ;;  %v3308_v58 = vmul.f32 %v1779_v43, %v3798_v57  ;;  %v3801_v46 = vld [vmem:[#allocation16_spill] sm:$0xff] }
 0x460   : > { %v1774_v50 = vpop.permute.xlu0 %1773  ;;  %v1904_v1 = vpop.permute.xlu1 %1903 }
 0x461   : > { %v1780_v49 = vsel %vm792_vm7, %v1766_v17, %v1774_v50  ;;  %v1784_v32 = vsel %vm792_vm7, %v1774_v50, %v1766_v17  ;;  %v1911_v9 = vsel %vm979_vm8, %v1896_v18, %v1904_v1  ;;  %v1915_v34 = vsel %vm979_vm8, %v1904_v1, %v1896_v18 }
 0x462   : > { %v3311_v12 = vmul.f32 %v1784_v32, %v3797_v8  ;;  %v3314_v31 = vmul.f32 %v1780_v49, %v3798_v57  ;;  %v3329_v39 = vmul.f32 %v1911_v9, %v3799_v35  ;;  %v3332_v40 = vmul.f32 %v1915_v34, %v3801_v46 }
 0x464   : > { %v1906_v38 = vpop.permute.xlu0 %1905  ;;  %v1986_v60 = vpop.permute.xlu1 %1985  ;;  %3800 = vst [vmem:[#allocation22_spill] sm:$0xff] %v3329_v39  ;;  %3802 = vst [vmem:[#allocation23_spill] sm:$0xff] %v3332_v40 }
 0x465   : > { %v1912_v13 = vsel %vm979_vm8, %v1898_v47, %v1906_v38  ;;  %v1916_v10 = vsel %vm979_vm8, %v1906_v38, %v1898_v47  ;;  %v1993_v23 = vsel %vm1081_vm9, %v1978_v52, %v1986_v60  ;;  %v1997_v27 = vsel %vm1081_vm9, %v1986_v60, %v1978_v52  ;;  %v3805_v60 = vld [vmem:[#allocation20_spill] sm:$0xff] }
 0x466   : > { %v3335_v43 = vmul.f32 %v1912_v13, %v3799_v35  ;;  %v3338_v50 = vmul.f32 %v1916_v10, %v3801_v46  ;;  %v3357_v13 = vmul.f32 %v1993_v23, %v3805_v60  ;;  %v3807_v10 = vld [vmem:[#allocation18_spill] sm:$0xff] }
 0x467   : > { %v3360_v47 = vmul.f32 %v1997_v27, %v3807_v10 }
 0x468   : > { %3803 = vst [vmem:[#allocation24_spill] sm:$0xff] %v3335_v43  ;;  %3804 = vst [vmem:[#allocation25_spill] sm:$0xff] %v3338_v50  ;;  %v1988_v1 = vpop.permute.xlu0 %1987  ;;  %v2068_v49 = vpop.permute.xlu1 %2067 }
 0x469   : > { %v1994_v32 = vsel %vm1081_vm9, %v3214_v53, %v1988_v1  ;;  %v1998_v9 = vsel %vm1081_vm9, %v1988_v1, %v3214_v53  ;;  %v2075_v34 = vsel %vm1183_vm10, %v3216_v55, %v2068_v49  ;;  %v2079_v38 = vsel %vm1183_vm10, %v2068_v49, %v3216_v55  ;;  %3806 = vst [vmem:[#allocation7_spill] sm:$0xff] %v3357_v13  ;;  %v3811_v49 = vld [vmem:[#allocation21_spill] sm:$0xff] }
 0x46a   : > { %3808 = vst [vmem:[#allocation8_spill] sm:$0xff] %v3360_v47  ;;  %v3363_v52 = vmul.f32 %v1994_v32, %v3805_v60  ;;  %v3366_v17 = vmul.f32 %v1998_v9, %v3807_v10  ;;  %v3379_v32 = vmul.f32 %v2075_v34, %v3811_v49  ;;  %v3813_v9 = vld [vmem:[#allocation19_spill] sm:$0xff] }
 0x46b   : > { %v3382_v7 = vmul.f32 %v2079_v38, %v3813_v9 }
 0x46c   : > { %3809 = vst [vmem:[#allocation9_spill] sm:$0xff] %v3363_v52  ;;  %3810 = vst [vmem:[#allocation10_spill] sm:$0xff] %v3366_v17  ;;  %v2070_v1 = vpop.permute.xlu0 %2069  ;;  %v1562_v18 = vpop.permute.xlu1 %1561 }
 0x46d   : > { %v2076_v23 = vsel %vm1183_vm10, %v3218_v51, %v2070_v1  ;;  %v2080_v27 = vsel %vm1183_vm10, %v2070_v1, %v3218_v51  ;;  %3812 = vst [vmem:[#allocation11_spill] sm:$0xff] %v3379_v32  ;;  %3814 = vst [vmem:[#allocation12_spill] sm:$0xff] %v3382_v7 }
 0x46e   : > { %v3385_v53 = vmul.f32 %v2076_v23, %v3811_v49  ;;  %v3388_v29 = vmul.f32 %v2080_v27, %v3813_v9 }
 0x470   : > { %3815 = vst [vmem:[#allocation13_spill] sm:$0xff] %v3385_v53  ;;  %3816 = vst [vmem:[#allocation14_spill] sm:$0xff] %v3388_v29  ;;  %v1564_v26 = vpop.permute.xlu0 %1563  ;;  %v1526_v37 = vpop.permute.xlu1 %1525 }
 0x474   : > { %v1528_v1 = vpop.permute.xlu0 %1527  ;;  %v1686_v34 = vpop.permute.xlu1 %1685 }
 0x478   : > { %v1688_v11 = vpop.permute.xlu0 %1687  ;;  %v1768_v4 = vpop.permute.xlu1 %1767 }
 0x47c   : > { %v1770_v38 = vpop.permute.xlu0 %1769  ;;  %v3394_v13 = vpop.permute.xlu1 %1899 }
 0x480   : > { %v3396_v23 = vpop.permute.xlu0 %1901  ;;  %v3398_v52 = vpop.permute.xlu1 %1981 }
 0x484   : > { %v3400_v27 = vpop.permute.xlu0 %1983  ;;  %v3402_v47 = vpop.permute.xlu1 %2063 }
 0x485   : > { %3817 = vst [vmem:[#allocation15_spill] sm:$0xff] %v3402_v47 }
 0x488   : > { %v3404_v55 = vpop.permute.xlu0 %2065  ;;  %v3406_v32 = vpop.permute.xlu1 %2145 }
 0x489   : > { %3818 = vst [vmem:[#allocation17_spill] sm:$0xff] %v3404_v55  ;;  %3819 = vst [vmem:[#allocation16_spill] sm:$0xff] %v3406_v32 }
 0x48c   : > { %v3408_v51 = vpop.permute.xlu0 %2147  ;;  %v1570_v53 = vpop.permute.xlu1 %1569 }
 0x48d   : > { %3820 = vst [vmem:[#allocation20_spill] sm:$0xff] %v3408_v51  ;;  %v1579_v7 = vsel %vm519_vm2, %v1570_v53, %v1562_v18  ;;  %v1575_v29 = vsel %vm519_vm2, %v1562_v18, %v1570_v53 }
 0x48e   : > { %v1585_v43 = vmul.f32 %v1579_v7, %v3791_v62  ;;  %v1586_v32 = vmul.f32 %v1575_v29, %v3792_v61 }
 0x490   : > { %v1572_v17 = vpop.permute.xlu0 %1571  ;;  %v1534_v39 = vpop.permute.xlu1 %1533 }
 0x491   : > { %v1576_v9 = vsel %vm519_vm2, %v1564_v26, %v1572_v17  ;;  %v1580_v49 = vsel %vm519_vm2, %v1572_v17, %v1564_v26  ;;  %v1543_v50 = vsel %vm500_vm3, %v1534_v39, %v1526_v37  ;;  %v1539_v18 = vsel %vm500_vm3, %v1526_v37, %v1534_v39 }
 0x492   : > { %v1587_v51 = vmul.f32 %v1580_v49, %v3791_v62  ;;  %v1588_v40 = vmul.f32 %v1576_v9, %v3792_v61  ;;  %v1549_v10 = vmul.f32 %v1543_v50, %v3793_v14  ;;  %v1550_v61 = vmul.f32 %v1539_v18, %v3794_v19 }
 0x493   : > { %v3821_v50 = vpack.c.bf16 %v3240_v3, %v3234_v59 }
 0x494   : > { %v1591_v53 = vpack.c.bf16 %v1587_v51, %v1585_v43  ;;  %v1536_v7 = vpop.permute.xlu0 %1535  ;;  %v1694_v55 = vpop.permute.xlu1 %1693  ;;  %v1592_v47 = vpack.c.bf16 %v1588_v40, %v1586_v32  ;;  %v3822_v51 = vpack.c.bf16 %v3237_v2, %v3231_v6 }
 0x495   : > { %v1540_v26 = vsel %vm500_vm3, %v1528_v1, %v1536_v7  ;;  %v1544_v62 = vsel %vm500_vm3, %v1536_v7, %v1528_v1  ;;  %v1703_v37 = vsel %vm690_vm5, %v1694_v55, %v1686_v34  ;;  %v1699_v39 = vsel %vm690_vm5, %v1686_v34, %v1694_v55 }
 0x496   : > { %v1551_v29 = vmul.f32 %v1544_v62, %v3793_v14  ;;  %v1552_v17 = vmul.f32 %v1540_v26, %v3794_v19  ;;  %1608 = vmatprep.subr.bf16.mxu1 %v1592_v47  ;;  %v1709_v14 = vmul.f32 %v1703_v37, %v3795_v45  ;;  %v1710_v9 = vmul.f32 %v1699_v39, %v3796_v30 }
 0x497   : > { %1609 = vmatpush1.bf16.msra.mxu1 %v1591_v53  ;;  %v1846_v37 = vpack.c.bf16 %v3099_v33, %v3093_v24  ;;  %v3828_v33 = vpack.c.bf16 %v3311_v12, %v3305_v0  ;;  %v1845_v12 = vpack.c.bf16 %v3067_v25, %v3063_v20  ;;  %v418_v20 = vld [vmem:[%s3681_s8 + $0x4] sm:$0x1] }
 0x498   : > { %v1555_v40 = vpack.c.bf16 %v1551_v29, %v1549_v10  ;;  %v1696_v43 = vpop.permute.xlu0 %1695  ;;  %1610 = vmatprep.subr.bf16.mxu1 %v3821_v50  ;;  %v1776_v49 = vpop.permute.xlu1 %1775  ;;  %v1556_v32 = vpack.c.bf16 %v1552_v17, %v1550_v61 }
 0x499   : > { %v1700_v19 = vsel %vm690_vm5, %v1688_v11, %v1696_v43  ;;  %v1704_v47 = vsel %vm690_vm5, %v1696_v43, %v1688_v11  ;;  %v1785_v59 = vsel %vm792_vm7, %v1776_v49, %v1768_v4  ;;  %v1781_v3 = vsel %vm792_vm7, %v1768_v4, %v1776_v49  ;;  %v415_v11 = vld [vmem:[%s3681_s8 + $0x1] sm:$0x1]  ;;  %v3829_v49 = vld [vmem:[#allocation18_spill] sm:$0xff] }
 0x49a   : > { %v1711_v55 = vmul.f32 %v1704_v47, %v3795_v45  ;;  %v1712_v10 = vmul.f32 %v1700_v19, %v3796_v30  ;;  %1652 = vmatprep.subr.bf16.mxu0 %v1556_v32  ;;  %v3823_v30 = vpack.c.bf16 %v3264_v44, %v3258_v22  ;;  %v1791_v4 = vmul.f32 %v1785_v59, %v3797_v8  ;;  %v414_v44 = vld [vmem:[%s3681_s8] sm:$0x1]  ;;  %v3831_v59 = vld [vmem:[#allocation17_spill] sm:$0xff] }
 0x49b   : > { %1611 = vmatpush1.bf16.msra.mxu1 %v3822_v51  ;;  %1653 = vmatpush1.bf16.msra.mxu0 %v1555_v40  ;;  %v1792_v53 = vmul.f32 %v1781_v3, %v3798_v57  ;;  %v3824_v22 = vpack.c.bf16 %v3261_v21, %v3255_v15  ;;  %v1848_v15 = vpack.c.bf16 %v3171_v54, %v3164_v48  ;;  %v3830_v47 = vld [vmem:[#allocation15_spill] sm:$0xff] }
 0x49c   : > { %v1715_v1 = vpack.c.bf16 %v1711_v55, %v1709_v14  ;;  %v1778_v45 = vpop.permute.xlu0 %1777  ;;  %1654 = vmatprep.subr.bf16.mxu0 %v3823_v30  ;;  %v3462_v34 = vpop.permute.xlu1 %2141  ;;  %v1716_v18 = vpack.c.bf16 %v1712_v10, %v1710_v9  ;;  %v3827_v48 = vpack.c.bf16 %v3314_v31, %v3308_v58  ;;  %v3835_v30 = vld [vmem:[#allocation21_spill] sm:$0xff] }
 0x49d   : > { %v1782_v6 = vsel %vm792_vm7, %v1770_v38, %v1778_v45  ;;  %v1786_v2 = vsel %vm792_vm7, %v1778_v45, %v1770_v38 }
 0x49e   : > { %v1793_v7 = vmul.f32 %v1786_v2, %v3797_v8  ;;  %v1794_v26 = vmul.f32 %v1782_v6, %v3798_v57  ;;  %2379 = vmatmul.mubr.msk.bf16.vlgmr.msra.gmra.mxu1 %vm1453_vm12, %v415_v11  ;;  %1732 = vmatprep.subr.bf16.mxu1 %v1716_v18  ;;  %v3825_v8 = vpack.c.bf16 %v3288_v28, %v3282_v41  ;;  %v416_v28 = vld [vmem:[%s3681_s8 + $0x2] sm:$0x1]  ;;  %v3832_v11 = vld [vmem:[#allocation25_spill] sm:$0xff] }
 0x49f   : > { %1655 = vmatpush1.bf16.msra.mxu0 %v3824_v22  ;;  %1733 = vmatpush1.bf16.msra.mxu1 %v1715_v1  ;;  %v3826_v41 = vpack.c.bf16 %v3285_v36, %v3279_v16  ;;  %v1847_v36 = vpack.c.bf16 %v3133_v63, %v3126_v5  ;;  %v417_v5 = vld [vmem:[%s3681_s8 + $0x3] sm:$0x1] }
 0x4a0   : > { %v1797_v62 = vpack.c.bf16 %v1793_v7, %v1791_v4  ;;  %v3479_v38 = vpop.permute.xlu0 %2143  ;;  %1734 = vmatprep.subr.bf16.mxu1 %v3825_v8  ;;  %v1908_v57 = vpop.permute.xlu1 %1907  ;;  %v1798_v61 = vpack.c.bf16 %v1794_v26, %v1792_v53  ;;  %1752 = vmatprep.mubr.bf16.mxu1 %v3782_v42  ;;  %v3833_v1 = vld [vmem:[#allocation23_spill] sm:$0xff]  ;;  %v3837_v7 = vld [vmem:[#allocation16_spill] sm:$0xff]  ;;  %v3839_v8 = vld [vmem:[#allocation22_spill] sm:$0xff] }
 0x4a1   : > { %v1913_v21 = vsel %vm979_vm8, %v3394_v13, %v1908_v57  ;;  %v1917_v29 = vsel %vm979_vm8, %v1908_v57, %v3394_v13  ;;  %v3834_v45 = vpack.c.bf16 %v3832_v11, %v3833_v1  ;;  %v3836_v4 = vld [vmem:[#allocation19_spill] sm:$0xff] }
 0x4a2   : > { %2380 = vmatmul.mubr.msk.bf16.vlgmr.msra.gmra.mxu0 %vm1453_vm12, %v414_v44  ;;  %1814 = vmatprep.subr.bf16.mxu0 %v1798_v61  ;;  %v1923_v58 = vmul.f32 %v1913_v21, %v3799_v35  ;;  %v1924_v31 = vmul.f32 %v1917_v29, %v3801_v46  ;;  %v419_v21 = vld [vmem:[%s3681_s8 + $0x5] sm:$0x1] }
 0x4a3   : > { %1735 = vmatpush1.bf16.msra.mxu1 %v3826_v41  ;;  %1815 = vmatpush1.bf16.msra.mxu0 %v1797_v62  ;;  %v3838_v62 = vld [vmem:[#allocation24_spill] sm:$0xff] }
 0x4a4   : > { %v1910_v17 = vpop.permute.xlu0 %1909  ;;  %1816 = vmatprep.subr.bf16.mxu0 %v3827_v48  ;;  %1864 = vmatprep.subr.bf16.mxu1 %v1848_v15  ;;  %v1990_v54 = vpop.permute.xlu1 %1989  ;;  %v3840_v57 = vpack.c.bf16 %v3838_v62, %v3839_v8  ;;  %v3841_v41 = vld [vmem:[#allocation20_spill] sm:$0xff]  ;;  %v3842_v48 = vld [vmem:[#allocation10_spill] sm:$0xff] }
 0x4a5   : > { %v1914_v13 = vsel %vm979_vm8, %v3396_v23, %v1910_v17  ;;  %v1918_v16 = vsel %vm979_vm8, %v1910_v17, %v3396_v23  ;;  %1834 = vmatprep.mubr.bf16.mxu0 %v3782_v42  ;;  %v1995_v23 = vsel %vm1081_vm9, %v3398_v52, %v1990_v54  ;;  %v1999_v24 = vsel %vm1081_vm9, %v1990_v54, %v3398_v52  ;;  %v3843_v54 = vld [vmem:[#allocation8_spill] sm:$0xff] }
 0x4a6   : > { %v1925_v39 = vmul.f32 %v1914_v13, %v3799_v35  ;;  %v1926_v40 = vmul.f32 %v1918_v16, %v3801_v46  ;;  %2381 = vmatmul.mubr.msk.bf16.vlgmr.msra.gmra.mxu1 %vm1453_vm12, %v416_v28  ;;  %v2005_v50 = vmul.f32 %v1995_v23, %v3805_v60  ;;  %v2006_v32 = vmul.f32 %v1999_v24, %v3829_v49  ;;  %v2466_v16 = vld [vmem:[%s3674_s1 + $0x10] ss:$0 sm:$0xff] }
 0x4a7   : > { %1817 = vmatpush1.bf16.msra.mxu0 %v3828_v33  ;;  %1865 = vmatpush1.bf16.msra.mxu1 %v1847_v36  ;;  %v3844_v13 = vpack.c.bf16 %v3842_v48, %v3843_v54  ;;  %v3845_v33 = vld [vmem:[#allocation9_spill] sm:$0xff] }
 0x4a8   : > { %v1929_v63 = vpack.c.bf16 %v1925_v39, %v1923_v58  ;;  %v1992_v35 = vpop.permute.xlu0 %1991  ;;  %1866 = vmatprep.subr.bf16.mxu1 %v1846_v37  ;;  %v2072_v46 = vpop.permute.xlu1 %2071  ;;  %v1930_v43 = vpack.c.bf16 %v1926_v40, %v1924_v31  ;;  %1884 = vmatprep.mubr.bf16.mxu1 %v3782_v42  ;;  %v2467_v37 = vld [vmem:[%s3674_s1 + $0x18] ss:$0 sm:$0xff] }
 0x4a9   : > { %v1996_v52 = vsel %vm1081_vm9, %v3400_v27, %v1992_v35  ;;  %v2000_v0 = vsel %vm1081_vm9, %v1992_v35, %v3400_v27  ;;  %v2077_v9 = vsel %vm1183_vm10, %v3830_v47, %v2072_v46  ;;  %v2081_v27 = vsel %vm1183_vm10, %v2072_v46, %v3830_v47  ;;  %v420_v46 = vld [vmem:[%s3681_s8 + $0x6] sm:$0x1] }
 0x4aa   : > { %v2007_v14 = vmul.f32 %v1996_v52, %v3805_v60  ;;  %v2008_v19 = vmul.f32 %v2000_v0, %v3829_v49  ;;  %2382 = vmatmul.mubr.msk.bf16.vlgmr.msra.gmra.mxu0 %vm1453_vm12, %v417_v5  ;;  %1946 = vmatprep.subr.bf16.mxu0 %v1930_v43  ;;  %v2087_v18 = vmul.f32 %v2077_v9, %v3835_v30  ;;  %v3846_v5 = vld [vmem:[#allocation7_spill] sm:$0xff]  ;;  %v3848_v0 = vld [vmem:[#allocation14_spill] sm:$0xff]  ;;  %v3851_v9 = vld [vmem:[#allocation13_spill] sm:$0xff] }
 0x4ab   : > { %1867 = vmatpush1.bf16.msra.mxu1 %v1845_v12  ;;  %1947 = vmatpush1.bf16.msra.mxu0 %v1929_v63  ;;  %v2088_v6 = vmul.f32 %v2081_v27, %v3836_v4  ;;  %v3847_v63 = vpack.c.bf16 %v3845_v33, %v3846_v5  ;;  %v3849_v12 = vld [vmem:[#allocation12_spill] sm:$0xff]  ;;  %v3852_v27 = vld [vmem:[#allocation11_spill] sm:$0xff] }
 0x4ac   : > { %v2011_v25 = vpack.c.bf16 %v2007_v14, %v2005_v50  ;;  %v2074_v60 = vpop.permute.xlu0 %2073  ;;  %v2154_v55 = vpop.permute.xlu1 %2153  ;;  %v2012_v10 = vpack.c.bf16 %v2008_v19, %v2006_v32  ;;  %1966 = vmatprep.mubr.bf16.mxu0 %v3782_v42  ;;  %1948 = vmatprep.subr.bf16.mxu0 %v3834_v45  ;;  %v3850_v50 = vpack.c.bf16 %v3848_v0, %v3849_v12 }
 0x4ad   : > { %v2078_v3 = vsel %vm1183_vm10, %v3831_v59, %v2074_v60  ;;  %v2082_v51 = vsel %vm1183_vm10, %v2074_v60, %v3831_v59  ;;  %v2159_v26 = vsel %vm1285_vm11, %v3837_v7, %v2154_v55  ;;  %v2163_v22 = vsel %vm1285_vm11, %v2154_v55, %v3837_v7 }
 0x4ae   : > { %v2089_v2 = vmul.f32 %v2078_v3, %v3835_v30  ;;  %v2090_v53 = vmul.f32 %v2082_v51, %v3836_v4  ;;  %2383 = vmatmul.mubr.msk.bf16.vlgmr.msra.gmra.mxu1 %vm1453_vm12, %v418_v20  ;;  %2028 = vmatprep.subr.bf16.mxu1 %v2012_v10  ;;  %v2169_v36 = vmul.f32 %v2466_v16, %v2159_v26 }
 0x4af   : > { %2048 = vmatprep.mubr.bf16.mxu1 %v3782_v42  ;;  %1949 = vmatpush1.bf16.msra.mxu0 %v3840_v57  ;;  %v2170_v58 = vmul.f32 %v2467_v37, %v2163_v22  ;;  %v3853_v20 = vpack.c.bf16 %v3851_v9, %v3852_v27  ;;  %v3855_v27 = vld [vmem:[#allocation6_spill] sm:$0xff] }
 0x4b0   : > { %v2093_v44 = vpack.c.bf16 %v2089_v2, %v2087_v18  ;;  %2029 = vmatpush1.bf16.msra.mxu1 %v2011_v25  ;;  %v2156_v61 = vpop.permute.xlu0 %2155  ;;  %v2150_v15 = vpop.permute.xlu1 %2149  ;;  %v2094_v29 = vpack.c.bf16 %v2090_v53, %v2088_v6  ;;  %v422_v25 = vld [vmem:[%s3681_s8 + $0x8] sm:$0x1] }
 0x4b1   : > { %v2160_v28 = vsel %vm1285_vm11, %v3841_v41, %v2156_v61  ;;  %v2164_v17 = vsel %vm1285_vm11, %v2156_v61, %v3841_v41  ;;  %2030 = vmatprep.subr.bf16.mxu1 %v3844_v13  ;;  %v2157_v40 = vsel %vm1285_vm11, %v3462_v34, %v2150_v15  ;;  %v2161_v23 = vsel %vm1285_vm11, %v2150_v15, %v3462_v34 }
 0x4b2   : > { %v2171_v31 = vmul.f32 %v2466_v16, %v2160_v28  ;;  %v2172_v39 = vmul.f32 %v2467_v37, %v2164_v17  ;;  %2110 = vmatprep.subr.bf16.mxu0 %v2094_v29  ;;  %2384 = vmatmul.mubr.msk.bf16.vlgmr.msra.gmra.mxu0 %vm1453_vm12, %v419_v21  ;;  %v2165_v49 = vmul.f32 %v2466_v16, %v2157_v40 }
 0x4b3   : > { %2111 = vmatpush1.bf16.msra.mxu0 %v2093_v44  ;;  %2130 = vmatprep.mubr.bf16.mxu0 %v3782_v42  ;;  %v2166_v32 = vmul.f32 %v2467_v37, %v2161_v23 }
 0x4b4   : > { %v2175_v24 = vpack.c.bf16 %v2171_v31, %v2169_v36  ;;  %2031 = vmatpush1.bf16.msra.mxu1 %v3847_v63  ;;  %v2152_v35 = vpop.permute.xlu0 %2151  ;;  %v2176_v43 = vpack.c.bf16 %v2172_v39, %v2170_v58  ;;  %2112 = vmatprep.subr.bf16.mxu0 %v3850_v50 }
 0x4b5   : > { %v2158_v52 = vsel %vm1285_vm11, %v3479_v38, %v2152_v35  ;;  %v2162_v34 = vsel %vm1285_vm11, %v2152_v35, %v3479_v38 }
 0x4b6   : > { %v2167_v14 = vmul.f32 %v2466_v16, %v2158_v52  ;;  %v2168_v19 = vmul.f32 %v2467_v37, %v2162_v34  ;;  %2192 = vmatprep.subr.bf16.mxu1 %v2176_v43 }
 0x4b7   : > { %2385 = vmatmul.mubr.msk.bf16.vlgmr.msra.gmra.mxu1 %vm1453_vm12, %v420_v46  ;;  %2113 = vmatpush1.bf16.msra.mxu0 %v3853_v20 }
 0x4b8   : > { %v2173_v47 = vpack.c.bf16 %v2167_v14, %v2165_v49  ;;  %2193 = vmatpush1.bf16.msra.mxu1 %v2175_v24  ;;  %v2174_v38 = vpack.c.bf16 %v2168_v19, %v2166_v32  ;;  %2212 = vmatprep.mubr.bf16.mxu1 %v3782_v42  ;;  %v3854_v19 = vld [vmem:[#allocation5_spill] sm:$0xff] }
 0x4ba   : > { %2194 = vmatprep.subr.bf16.mxu1 %v2174_v38  ;;  %2386 = vmatmul.mubr.msk.bf16.vlgmr.msra.gmra.mxu0 %vm1453_vm12, %v421_v56 }
 0x4bc   : > { %2195 = vmatpush1.bf16.msra.mxu1 %v2173_v47 }
 0x4bd   : > { %v2226_v35 = vpop.permute.xlu1 %2225 }
 0x4bf   : > { %2387 = vmatmul.mubr.msk.bf16.vlgmr.msra.gmra.mxu1 %vm1453_vm12, %v422_v25 }
 0x55e   : > { %v1630_v60 = vpop.f32.mrf.mxu1 }
 0x560   : > { %v1632_v55 = vpop.f32.mrf.mxu1 }
 0x562   : > { %v1634_v10 = vpop.f32.mrf.mxu1  ;;  %v1674_v59 = vpop.f32.mrf.mxu0 }
 0x563   : > { %v1675_v22 = vadd.f32 %v1674_v59, %v1630_v60 }
 0x564   : > { %v1635_v3 = vpop.f32.mrf.mxu1  ;;  %v1676_v51 = vpop.f32.mrf.mxu0 }
 0x565   : > { %v1677_v8 = vadd.f32 %v1676_v51, %v1632_v55 }
 0x566   : > { %v1678_v11 = vpop.f32.mrf.mxu0  ;;  %v1754_v1 = vpop.f32.mrf.mxu1 }
 0x567   : > { %v1761_v57 = vadd.f32 %v1754_v1, %v1675_v22 }
 0x568   : > { %v1679_v45 = vpop.f32.mrf.mxu0  ;;  %v1756_v42 = vpop.f32.mrf.mxu1 }
 0x569   : > { %v1762_v21 = vadd.f32 %v1756_v42, %v1677_v8 }
 0x56a   : > { %v1758_v30 = vpop.f32.mrf.mxu1  ;;  %v1836_v18 = vpop.f32.mrf.mxu0 }
 0x56b   : > { %v1843_v29 = vadd.f32 %v1836_v18, %v1761_v57 }
 0x56c   : > { %v1759_v4 = vpop.f32.mrf.mxu1  ;;  %v1838_v6 = vpop.f32.mrf.mxu0 }
 0x56d   : > { %v1844_v17 = vadd.f32 %v1838_v6, %v1762_v21 }
 0x56e   : > { %v1840_v2 = vpop.f32.mrf.mxu0  ;;  %v1886_v53 = vpop.f32.mrf.mxu1 }
 0x56f   : > { %v1893_v48 = vadd.f32 %v1886_v53, %v1843_v29 }
 0x570   : > { %v1841_v7 = vpop.f32.mrf.mxu0  ;;  %v1888_v26 = vpop.f32.mrf.mxu1 }
 0x571   : > { %v1894_v16 = vadd.f32 %v1888_v26, %v1844_v17 }
 0x572   : > { %v1890_v44 = vpop.f32.mrf.mxu1  ;;  %v1968_v62 = vpop.f32.mrf.mxu0 }
 0x573   : > { %v1975_v36 = vadd.f32 %v1968_v62, %v1893_v48 }
 0x574   : > { %v1891_v61 = vpop.f32.mrf.mxu1  ;;  %v1970_v15 = vpop.f32.mrf.mxu0 }
 0x575   : > { %v1976_v31 = vadd.f32 %v1970_v15, %v1894_v16 }
 0x576   : > { %v1972_v41 = vpop.f32.mrf.mxu0 }
 0x577   : > { %v2050_v28 = vpop.f32.mrf.mxu1 }
 0x578   : > { %v1973_v54 = vpop.f32.mrf.mxu0  ;;  %v2057_v39 = vadd.f32 %v2050_v28, %v1975_v36 }
 0x579   : > { %v2052_v13 = vpop.f32.mrf.mxu1 }
 0x57a   : > { %v2132_v58 = vpop.f32.mrf.mxu0  ;;  %v2058_v24 = vadd.f32 %v2052_v13, %v1976_v31 }
 0x57b   : > { %v2054_v37 = vpop.f32.mrf.mxu1  ;;  %v2139_v33 = vadd.f32 %v2132_v58, %v2057_v39 }
 0x57c   : > { %v2134_v23 = vpop.f32.mrf.mxu0 }
 0x57d   : > { %v2055_v40 = vpop.f32.mrf.mxu1  ;;  %v2140_v46 = vadd.f32 %v2134_v23, %v2058_v24 }
 0x57e   : > { %v2136_v63 = vpop.f32.mrf.mxu0 }
 0x57f   : > { %v2214_v5 = vpop.f32.mrf.mxu1 }
 0x580   : > { %v2221_v43 = vadd.f32 %v2214_v5, %v2139_v33  ;;  %v2137_v34 = vpop.f32.mrf.mxu0 }
 0x581   : > { %v2216_v52 = vpop.f32.mrf.mxu1 }
 0x582   : > { %v2228_v0 = vadd.f32 %v2226_v35, %v2221_v43  ;;  %v2222_v12 = vadd.f32 %v2216_v52, %v2140_v46 }
 0x583   : > { %v2218_v50 = vpop.f32.mrf.mxu1 }
 0x584   : > { %v2232_v49 = vrot.slane %v2228_v0, 6  ;;  %v2229_v32 = vadd.f32 %v2226_v35, %v2222_v12 }
 0x585   : > { %v2219_v14 = vpop.f32.mrf.mxu1 }
 0x586   : > { %v2236_v47 = vadd.f32 %v2232_v49, %v3854_v19  ;;  %v2233_v9 = vrot.slane %v2229_v32, 6 }
 0x588   : > { %v2237_v20 = vadd.f32 %v2233_v9, %v3855_v27  ;;  %v2238_v56 = vsel %vm446_vm0, %v3854_v19, %v2236_v47 }
 0x58a   : > { %v2239_v38 = vsel %vm446_vm0, %v3855_v27, %v2237_v20 }
 0x58b   : > { %v2242_v25 = vcombine.low %v2238_v56, %v2239_v38 }
 0x58d   : > { %2244 = vst [vmem:[%s352_s27] sm:$0xff] %v2242_v25 }
 0x58e   : > { %2481 = shalt.err (!%p2478_p3)
}
 0x58f   : > { %s2482_s0 = scalar_lea.hbm %s2258_s30, 128  ;;  %s2486_s27 = scalar_lea.hbm %s3683_s10, 256 }
 0x590   : > { %p2483_p4 = scmp.ne.s32.totalorder %s2258_s30, %s2482_s0  ;;  %p2487_p9 = scmp.lt.s32.totalorder %s2258_s30, %s3683_s10 }
 0x591   : > { %p2488_p10 = scmp.lt.s32.totalorder %s2486_s27, %s2482_s0 }
 0x592   : > { %p2484_p7 = pnand %p2483_p4, %p2634_p5 }
 0x593   : > { %p2489_p11 = por %p2488_p10, %p2487_p9 }
 0x594   : > { %p2485_p8 = pneg %p2484_p7 }
 0x596   : > { %p2490_p12 = pnand %p2489_p11, %p2485_p8 }
 0x598   : > { %2493 = shalt.err (!%p2490_p12)
}
 0x599   : > { %2395 = dma.vmem_to_hbm [thread:$0]  (%p2634_p5), %s2261_s25, 128, %s2258_s30, %s2246_s11  }
 0x59a PF: > { %p2401_p13 = scmp.ge.s32.totalorder %s2528_s16, 2  ;;  %s2272_s20 = sand.u32 1, %s2516_s13  }
 0x59b   : > { %s2273_s17 = scalar_lea.sflag [#allocation3], %s2272_s20 }
 0x59c   : > { %p2398_p0 = pnand %p2401_p13, %p2638_p6 }
 0x59e   : > { %p2399_p1 = pneg %p2398_p0 }
 0x5a0   : > { %2511 = dma.done.wait (%p2399_p1), %s2273_s17, 128  }
 0x5a1   : > { %2513 = vsyncadd (%p2399_p1), %s2273_s17, 4294967168  ;;  %p20_p2 = scmp.ge.s32.totalorder %s2621_s19, 4   ;;  %s3856_s13 = smov %s2520_s14 }
 0x5a2   : > { %s3857_s14 = smov %s2524_s15  ;;  %s3858_s15 = smov %s2632_s22 }
 0x5a3   : > { %s3859_s16 = smov %s2621_s19  ;;  %22 = sbr.rel (!%p20_p2) target bundleno = 5 (0x5), region = 95 }
 0x5a8   :  { %2278 = vsyncpa [#allocation3], 1 }
 0x5a9   :  { %2280 = vsyncpa [#allocation3 + $0x1], 1 }

</bundles_post_ra>
